<compile_context>
chip_gen: v6e
topology: v6e:2x2x1
jax: 0.10.0
libtpu: 0.0.40
codegen_flags: <defaults>
</compile_context>

<pallas_src>
import jax
import jax.numpy as jnp
from jax.experimental import pallas as pl
from jax.experimental.pallas import tpu as pltpu


def _pad_to(n, m):
    return ((n + m - 1) // m) * m


# ----------------------------------------------------------------------------
# Pallas kernel: entire MLP hot path for one batch tile
# ----------------------------------------------------------------------------
def _fc_fft_kernel(x_ref,
                   w1, b1, w2, b2, w3, b3, w4, b4, w5, b5,
                   w6t, b6,
                   o_ref):
    def hidden(h, w_ref, b_ref):
        # Linear (bf16 MXU matmul, f32 accumulation) + ReLU.
        # Dropout(p=0.2) -> identity in eval mode.
        # TODO(synk): training-mode dropout (stochastic masking) not implemented.
        # BatchNorm1d (eval) is pre-folded into the next layer's weight/bias.
        y = jnp.dot(h, w_ref[...], preferred_element_type=jnp.float32) + b_ref[...]
        return jnp.maximum(y, 0.0).astype(jnp.bfloat16)

    h = x_ref[...]                      # (TB, 800) bf16
    h = hidden(h, w1, b1)               # -> (TB, 128)
    h = hidden(h, w2, b2)
    h = hidden(h, w3, b3)
    h = hidden(h, w4, b4)
    h = hidden(h, w5, b5)
    # Final Linear computed transposed so the output block is lane-packed:
    #   out[j, t] = sum_k w6t[j, k] * h[t, k]   -> (OUT_SUB, TB)
    out = jax.lax.dot_general(w6t[...], h, (((1,), (1,)), ((), ())),
                              preferred_element_type=jnp.float32)
    o_ref[...] = out + b6[...]


# ----------------------------------------------------------------------------
# Parameter construction (deterministic, synthetic)
# ----------------------------------------------------------------------------
def make_params(key, input_size=800, output_size=1):
    dims = [input_size, 100, 50, 25, 25, 25, output_size]
    params = []
    for li in range(6):
        d_in, d_out = dims[li], dims[li + 1]
        key, kw, kb, kg, kbe, km, kv = jax.random.split(key, 7)
        w = jax.random.normal(kw, (d_in, d_out), jnp.float32) * 0.05
        b = jax.random.normal(kb, (d_out,), jnp.float32) * 0.05
        layer = {"w": w, "b": b}
        if li < 5:  # layers followed by BatchNorm1d
            layer["gamma"] = 1.0 + 0.1 * jax.random.normal(kg, (d_out,), jnp.float32)
            layer["beta"] = 0.1 * jax.random.normal(kbe, (d_out,), jnp.float32)
            layer["mean"] = 0.1 * jax.random.normal(km, (d_out,), jnp.float32)
            layer["var"] = 1.0 + 0.1 * jnp.abs(jax.random.normal(kv, (d_out,), jnp.float32))
        params.append(layer)
    return params, dims


# ----------------------------------------------------------------------------
# One-time parameter preparation: fold BN into next Linear, pad, cast to bf16
# ----------------------------------------------------------------------------
def prepare_params(params, dims, eps=1e-5):
    nl = len(params)                       # 6
    out_size = dims[-1]

    # Fold each BatchNorm1d affine (eval) into the following Linear (exact, f32):
    #   relu * s + t, then @W + b  ==  relu @ (s[:,None]*W) + (t@W + b)
    w_eff = [params[0]["w"]]
    b_eff = [params[0]["b"]]
    for li in range(1, nl):
        prev = params[li - 1]
        s = prev["gamma"] * jax.lax.rsqrt(prev["var"] + eps)
        t = prev["beta"] - prev["mean"] * s
        w_eff.append(s[:, None] * params[li]["w"])
        b_eff.append(params[li]["b"] + t @ params[li]["w"])

    # Pad hidden dims to 128 lanes; input feature dim (800) stays unpadded
    # (block last dim == full array dim is legal).  Weights in bf16.
    ws, bs = [], []
    for li in range(nl - 1):               # hidden layers 1..5 (with ReLU)
        d_i = dims[li] if li == 0 else _pad_to(dims[li], 128)
        d_o = _pad_to(dims[li + 1], 128)
        w_p = jnp.zeros((d_i, d_o), jnp.float32).at[:dims[li], :dims[li + 1]].set(w_eff[li])
        b_p = jnp.zeros((1, d_o), jnp.float32).at[0, :dims[li + 1]].set(b_eff[li])
        ws.append(w_p.astype(jnp.bfloat16))
        bs.append(b_p)

    # Final layer stored transposed so the kernel's output block is lane-packed.
    out_sub = _pad_to(out_size, 8)
    d_i = _pad_to(dims[nl - 1], 128)
    w6t = jnp.zeros((out_sub, d_i), jnp.float32).at[:out_size, :dims[nl - 1]].set(w_eff[nl - 1].T)
    b6 = jnp.zeros((out_sub, 1), jnp.float32).at[:out_size, 0].set(b_eff[nl - 1])

    return {"ws": ws, "bs": bs,
            "w6t": w6t.astype(jnp.bfloat16), "b6": b6,
            "d_in": dims[0], "out_size": out_size, "out_sub": out_sub}


# ----------------------------------------------------------------------------
# Forward wrapper
# ----------------------------------------------------------------------------
def fc_fft_forward(x, proc, tb=1024):
    """x: (B, input_size) -> squeezed output like torch.squeeze(fc(x))."""
    B, d_in = x.shape
    assert d_in == proc["d_in"]

    if B <= tb:
        TB, B_pad = B, B                   # single tile: block dims == full dims
        x_in = x
    else:
        assert tb % 128 == 0, "multi-tile batch requires tb to be a multiple of 128"
        TB = tb
        B_pad = _pad_to(B, TB)
        x_in = x if B_pad == B else jnp.concatenate(
            [x, jnp.zeros((B_pad - B, d_in), x.dtype)], axis=0)
    x_in = x_in.astype(jnp.bfloat16)       # halve the dominant HBM stream
    G = B_pad // TB
    out_sub = proc["out_sub"]

    # x streams per batch tile; all parameters are VMEM-resident (block idx 0,0).
    in_specs = [pl.BlockSpec((TB, d_in), lambda i: (i, 0))]
    args = [x_in]
    for w_p, b_p in zip(proc["ws"], proc["bs"]):
        in_specs += [pl.BlockSpec(w_p.shape, lambda i: (0, 0)),
                     pl.BlockSpec(b_p.shape, lambda i: (0, 0))]
        args += [w_p, b_p]
    in_specs += [pl.BlockSpec(proc["w6t"].shape, lambda i: (0, 0)),
                 pl.BlockSpec(proc["b6"].shape, lambda i: (0, 0))]
    args += [proc["w6t"], proc["b6"]]

    out_p = pl.pallas_call(
        _fc_fft_kernel,
        out_shape=jax.ShapeDtypeStruct((out_sub, B_pad), jnp.float32),
        grid=(G,),
        in_specs=in_specs,
        out_specs=pl.BlockSpec((out_sub, TB), lambda i: (0, i)),
        compiler_params=pltpu.CompilerParams(
            dimension_semantics=("parallel",),          # v7x: shard tiles over 2 TCs
            vmem_limit_bytes=48 * 1024 * 1024),
    )(*args)

    out = out_p[: proc["out_size"], :B].T   # (B, output_size)
    return jnp.squeeze(out)                 # torch.squeeze semantics


# ----------------------------------------------------------------------------
# References
# ----------------------------------------------------------------------------
def fc_fft_reference_f32(x, params, dims, eps=1e-5):
    """Exact f32 eval-mode forward of the original module (unfused)."""
    h = x
    for li, layer in enumerate(params):
        h = h @ layer["w"] + layer["b"]
        if li < len(params) - 1:
            h = jnp.maximum(h, 0.0)
            h = (h - layer["mean"]) * jax.lax.rsqrt(layer["var"] + eps) \
                * layer["gamma"] + layer["beta"]
    return jnp.squeeze(h)


def fc_fft_reference_bf16(x, proc):
    """Same folded/padded bf16 math as the kernel, in plain jnp (mechanics check)."""
    h = x.astype(jnp.bfloat16)
    for w_p, b_p in zip(proc["ws"], proc["bs"]):
        h = jnp.dot(h, w_p, preferred_element_type=jnp.float32) + b_p
        h = jnp.maximum(h, 0.0).astype(jnp.bfloat16)
    out = jax.lax.dot_general(proc["w6t"], h, (((1,), (1,)), ((), ())),
                              preferred_element_type=jnp.float32) + proc["b6"]
    return jnp.squeeze(out[: proc["out_size"], :].T)


if __name__ == "__main__":
    key = jax.random.PRNGKey(0)
    kx, kp = jax.random.split(key)

    B, INPUT_SIZE, OUTPUT_SIZE = 256, 800, 1
    x = jax.random.normal(kx, (B, INPUT_SIZE), jnp.float32)
    params, dims = make_params(kp, INPUT_SIZE, OUTPUT_SIZE)

    # Parameter folding/padding hoisted out of the per-call path.
    proc = prepare_params(params, dims)

    out = fc_fft_forward(x, proc, tb=128)   # 2 batch tiles -> exercises the grid
    out = jax.block_until_ready(out)

    ref_bf16 = fc_fft_reference_bf16(x, proc)
    ref_f32 = fc_fft_reference_f32(x, params, dims)

    assert out.shape == ref_f32.shape == (B,)
    assert jnp.allclose(out, ref_bf16, atol=2e-3, rtol=2e-3), \
        float(jnp.max(jnp.abs(out - ref_bf16)))
    assert jnp.allclose(out, ref_f32, atol=5e-2, rtol=5e-2), \
        float(jnp.max(jnp.abs(out - ref_f32)))

    print("KERNEL_OK")
</pallas_src>

<mosaic_0001>
module attributes {stable_mosaic.version = 11 : i64} {
  func.func @_fc_fft_kernel(%arg0: i32, %arg1: memref<128x800xbf16, #tpu.memory_space<vmem>>, %arg2: memref<800x128xbf16, #tpu.memory_space<vmem>>, %arg3: memref<1x128xf32, #tpu.memory_space<vmem>>, %arg4: memref<128x128xbf16, #tpu.memory_space<vmem>>, %arg5: memref<1x128xf32, #tpu.memory_space<vmem>>, %arg6: memref<128x128xbf16, #tpu.memory_space<vmem>>, %arg7: memref<1x128xf32, #tpu.memory_space<vmem>>, %arg8: memref<128x128xbf16, #tpu.memory_space<vmem>>, %arg9: memref<1x128xf32, #tpu.memory_space<vmem>>, %arg10: memref<128x128xbf16, #tpu.memory_space<vmem>>, %arg11: memref<1x128xf32, #tpu.memory_space<vmem>>, %arg12: memref<8x128xbf16, #tpu.memory_space<vmem>>, %arg13: memref<8x1xf32, #tpu.memory_space<vmem>>, %arg14: memref<8x128xf32, #tpu.memory_space<vmem>>) attributes {dimension_semantics = [#tpu.dimension_semantics<parallel>], iteration_bounds = array<i64: 2>, scalar_prefetch = 0 : i64, scratch_operands = 0 : i64, tpu.core_type = #tpu.core_type<tc>, window_params = [{transform_indices = @transform_0, window_bounds = array<i64: 128, 800>}, {pipeline_mode = #tpu.pipeline_mode<synchronous>, transform_indices = @transform_1, window_bounds = array<i64: 800, 128>}, {pipeline_mode = #tpu.pipeline_mode<synchronous>, transform_indices = @transform_2, window_bounds = array<i64: 1, 128>}, {pipeline_mode = #tpu.pipeline_mode<synchronous>, transform_indices = @transform_3, window_bounds = array<i64: 128, 128>}, {pipeline_mode = #tpu.pipeline_mode<synchronous>, transform_indices = @transform_4, window_bounds = array<i64: 1, 128>}, {pipeline_mode = #tpu.pipeline_mode<synchronous>, transform_indices = @transform_5, window_bounds = array<i64: 128, 128>}, {pipeline_mode = #tpu.pipeline_mode<synchronous>, transform_indices = @transform_6, window_bounds = array<i64: 1, 128>}, {pipeline_mode = #tpu.pipeline_mode<synchronous>, transform_indices = @transform_7, window_bounds = array<i64: 128, 128>}, {pipeline_mode = #tpu.pipeline_mode<synchronous>, transform_indices = @transform_8, window_bounds = array<i64: 1, 128>}, {pipeline_mode = #tpu.pipeline_mode<synchronous>, transform_indices = @transform_9, window_bounds = array<i64: 128, 128>}, {pipeline_mode = #tpu.pipeline_mode<synchronous>, transform_indices = @transform_10, window_bounds = array<i64: 1, 128>}, {pipeline_mode = #tpu.pipeline_mode<synchronous>, transform_indices = @transform_11, window_bounds = array<i64: 8, 128>}, {pipeline_mode = #tpu.pipeline_mode<synchronous>, transform_indices = @transform_12, window_bounds = array<i64: 8, 1>}, {transform_indices = @transform_13, window_bounds = array<i64: 8, 128>}]} {
    %c0 = arith.constant 0 : index
    %c0_0 = arith.constant 0 : index
    %0 = vector.load %arg1[%c0, %c0_0] : memref<128x800xbf16, #tpu.memory_space<vmem>>, vector<128x800xbf16>
    %c0_1 = arith.constant 0 : index
    %c0_2 = arith.constant 0 : index
    %1 = vector.load %arg2[%c0_1, %c0_2] : memref<800x128xbf16, #tpu.memory_space<vmem>>, vector<800x128xbf16>
    %cst = arith.constant dense<0.000000e+00> : vector<128x128xf32>
    %2 = tpu.matmul %0, %1, %cst {dimension_numbers = #tpu.dot_dimension_numbers<[1], [0], [0], [1], [0, 0, 1, 1], [], []>} : vector<128x800xbf16>, vector<800x128xbf16>, vector<128x128xf32> -> vector<128x128xf32>
    %c0_3 = arith.constant 0 : index
    %c0_4 = arith.constant 0 : index
    %3 = vector.load %arg3[%c0_3, %c0_4] : memref<1x128xf32, #tpu.memory_space<vmem>>, vector<1x128xf32>
    %4 = vector.broadcast %3 : vector<1x128xf32> to vector<128x128xf32>
    %5 = arith.addf %2, %4 : vector<128x128xf32>
    %cst_5 = arith.constant 0.000000e+00 : f32
    %6 = vector.broadcast %cst_5 : f32 to vector<128x128xf32>
    %7 = arith.maximumf %5, %6 : vector<128x128xf32>
    %8 = arith.truncf %7 : vector<128x128xf32> to vector<128x128xbf16>
    %c0_6 = arith.constant 0 : index
    %c0_7 = arith.constant 0 : index
    %9 = vector.load %arg4[%c0_6, %c0_7] : memref<128x128xbf16, #tpu.memory_space<vmem>>, vector<128x128xbf16>
    %cst_8 = arith.constant dense<0.000000e+00> : vector<128x128xf32>
    %10 = tpu.matmul %8, %9, %cst_8 {dimension_numbers = #tpu.dot_dimension_numbers<[1], [0], [0], [1], [0, 0, 1, 1], [], []>} : vector<128x128xbf16>, vector<128x128xbf16>, vector<128x128xf32> -> vector<128x128xf32>
    %c0_9 = arith.constant 0 : index
    %c0_10 = arith.constant 0 : index
    %11 = vector.load %arg5[%c0_9, %c0_10] : memref<1x128xf32, #tpu.memory_space<vmem>>, vector<1x128xf32>
    %12 = vector.broadcast %11 : vector<1x128xf32> to vector<128x128xf32>
    %13 = arith.addf %10, %12 : vector<128x128xf32>
    %cst_11 = arith.constant 0.000000e+00 : f32
    %14 = vector.broadcast %cst_11 : f32 to vector<128x128xf32>
    %15 = arith.maximumf %13, %14 : vector<128x128xf32>
    %16 = arith.truncf %15 : vector<128x128xf32> to vector<128x128xbf16>
    %c0_12 = arith.constant 0 : index
    %c0_13 = arith.constant 0 : index
    %17 = vector.load %arg6[%c0_12, %c0_13] : memref<128x128xbf16, #tpu.memory_space<vmem>>, vector<128x128xbf16>
    %cst_14 = arith.constant dense<0.000000e+00> : vector<128x128xf32>
    %18 = tpu.matmul %16, %17, %cst_14 {dimension_numbers = #tpu.dot_dimension_numbers<[1], [0], [0], [1], [0, 0, 1, 1], [], []>} : vector<128x128xbf16>, vector<128x128xbf16>, vector<128x128xf32> -> vector<128x128xf32>
    %c0_15 = arith.constant 0 : index
    %c0_16 = arith.constant 0 : index
    %19 = vector.load %arg7[%c0_15, %c0_16] : memref<1x128xf32, #tpu.memory_space<vmem>>, vector<1x128xf32>
    %20 = vector.broadcast %19 : vector<1x128xf32> to vector<128x128xf32>
    %21 = arith.addf %18, %20 : vector<128x128xf32>
    %cst_17 = arith.constant 0.000000e+00 : f32
    %22 = vector.broadcast %cst_17 : f32 to vector<128x128xf32>
    %23 = arith.maximumf %21, %22 : vector<128x128xf32>
    %24 = arith.truncf %23 : vector<128x128xf32> to vector<128x128xbf16>
    %c0_18 = arith.constant 0 : index
    %c0_19 = arith.constant 0 : index
    %25 = vector.load %arg8[%c0_18, %c0_19] : memref<128x128xbf16, #tpu.memory_space<vmem>>, vector<128x128xbf16>
    %cst_20 = arith.constant dense<0.000000e+00> : vector<128x128xf32>
    %26 = tpu.matmul %24, %25, %cst_20 {dimension_numbers = #tpu.dot_dimension_numbers<[1], [0], [0], [1], [0, 0, 1, 1], [], []>} : vector<128x128xbf16>, vector<128x128xbf16>, vector<128x128xf32> -> vector<128x128xf32>
    %c0_21 = arith.constant 0 : index
    %c0_22 = arith.constant 0 : index
    %27 = vector.load %arg9[%c0_21, %c0_22] : memref<1x128xf32, #tpu.memory_space<vmem>>, vector<1x128xf32>
    %28 = vector.broadcast %27 : vector<1x128xf32> to vector<128x128xf32>
    %29 = arith.addf %26, %28 : vector<128x128xf32>
    %cst_23 = arith.constant 0.000000e+00 : f32
    %30 = vector.broadcast %cst_23 : f32 to vector<128x128xf32>
    %31 = arith.maximumf %29, %30 : vector<128x128xf32>
    %32 = arith.truncf %31 : vector<128x128xf32> to vector<128x128xbf16>
    %c0_24 = arith.constant 0 : index
    %c0_25 = arith.constant 0 : index
    %33 = vector.load %arg10[%c0_24, %c0_25] : memref<128x128xbf16, #tpu.memory_space<vmem>>, vector<128x128xbf16>
    %cst_26 = arith.constant dense<0.000000e+00> : vector<128x128xf32>
    %34 = tpu.matmul %32, %33, %cst_26 {dimension_numbers = #tpu.dot_dimension_numbers<[1], [0], [0], [1], [0, 0, 1, 1], [], []>} : vector<128x128xbf16>, vector<128x128xbf16>, vector<128x128xf32> -> vector<128x128xf32>
    %c0_27 = arith.constant 0 : index
    %c0_28 = arith.constant 0 : index
    %35 = vector.load %arg11[%c0_27, %c0_28] : memref<1x128xf32, #tpu.memory_space<vmem>>, vector<1x128xf32>
    %36 = vector.broadcast %35 : vector<1x128xf32> to vector<128x128xf32>
    %37 = arith.addf %34, %36 : vector<128x128xf32>
    %cst_29 = arith.constant 0.000000e+00 : f32
    %38 = vector.broadcast %cst_29 : f32 to vector<128x128xf32>
    %39 = arith.maximumf %37, %38 : vector<128x128xf32>
    %40 = arith.truncf %39 : vector<128x128xf32> to vector<128x128xbf16>
    %c0_30 = arith.constant 0 : index
    %c0_31 = arith.constant 0 : index
    %41 = vector.load %arg12[%c0_30, %c0_31] : memref<8x128xbf16, #tpu.memory_space<vmem>>, vector<8x128xbf16>
    %cst_32 = arith.constant dense<0.000000e+00> : vector<8x128xf32>
    %42 = tpu.matmul %41, %40, %cst_32 {dimension_numbers = #tpu.dot_dimension_numbers<[1], [1], [0], [0], [0, 0, 1, 0], [], []>} : vector<8x128xbf16>, vector<128x128xbf16>, vector<8x128xf32> -> vector<8x128xf32>
    %c0_33 = arith.constant 0 : index
    %c0_34 = arith.constant 0 : index
    %43 = vector.load %arg13[%c0_33, %c0_34] : memref<8x1xf32, #tpu.memory_space<vmem>>, vector<8x1xf32>
    %44 = vector.broadcast %43 : vector<8x1xf32> to vector<8x128xf32>
    %45 = arith.addf %42, %44 : vector<8x128xf32>
    %c0_35 = arith.constant 0 : index
    %c0_36 = arith.constant 0 : index
    %46 = vector.load %arg14[%c0_35, %c0_36] : memref<8x128xf32, #tpu.memory_space<vmem>>, vector<8x128xf32>
    tpu.vector_store %arg14[%c0_35, %c0_36], %45 {strides = array<i32>} : memref<8x128xf32, #tpu.memory_space<vmem>>, vector<8x128xf32>,
    return
  }
  func.func @transform_0(%arg0: i32) -> (i32, i32) {
    %c0_i32 = arith.constant 0 : i32
    %c0_i32_0 = arith.constant 0 : i32
    return %arg0, %c0_i32 : i32, i32
  }
  func.func @transform_1(%arg0: i32) -> (i32, i32) {
    %c0_i32 = arith.constant 0 : i32
    %c0_i32_0 = arith.constant 0 : i32
    %c0_i32_1 = arith.constant 0 : i32
    return %c0_i32, %c0_i32_0 : i32, i32
  }
  func.func @transform_2(%arg0: i32) -> (i32, i32) {
    %c0_i32 = arith.constant 0 : i32
    %c0_i32_0 = arith.constant 0 : i32
    %c0_i32_1 = arith.constant 0 : i32
    return %c0_i32, %c0_i32_0 : i32, i32
  }
  func.func @transform_3(%arg0: i32) -> (i32, i32) {
    %c0_i32 = arith.constant 0 : i32
    %c0_i32_0 = arith.constant 0 : i32
    %c0_i32_1 = arith.constant 0 : i32
    return %c0_i32, %c0_i32_0 : i32, i32
  }
  func.func @transform_4(%arg0: i32) -> (i32, i32) {
    %c0_i32 = arith.constant 0 : i32
    %c0_i32_0 = arith.constant 0 : i32
    %c0_i32_1 = arith.constant 0 : i32
    return %c0_i32, %c0_i32_0 : i32, i32
  }
  func.func @transform_5(%arg0: i32) -> (i32, i32) {
    %c0_i32 = arith.constant 0 : i32
    %c0_i32_0 = arith.constant 0 : i32
    %c0_i32_1 = arith.constant 0 : i32
    return %c0_i32, %c0_i32_0 : i32, i32
  }
  func.func @transform_6(%arg0: i32) -> (i32, i32) {
    %c0_i32 = arith.constant 0 : i32
    %c0_i32_0 = arith.constant 0 : i32
    %c0_i32_1 = arith.constant 0 : i32
    return %c0_i32, %c0_i32_0 : i32, i32
  }
  func.func @transform_7(%arg0: i32) -> (i32, i32) {
    %c0_i32 = arith.constant 0 : i32
    %c0_i32_0 = arith.constant 0 : i32
    %c0_i32_1 = arith.constant 0 : i32
    return %c0_i32, %c0_i32_0 : i32, i32
  }
  func.func @transform_8(%arg0: i32) -> (i32, i32) {
    %c0_i32 = arith.constant 0 : i32
    %c0_i32_0 = arith.constant 0 : i32
    %c0_i32_1 = arith.constant 0 : i32
    return %c0_i32, %c0_i32_0 : i32, i32
  }
  func.func @transform_9(%arg0: i32) -> (i32, i32) {
    %c0_i32 = arith.constant 0 : i32
    %c0_i32_0 = arith.constant 0 : i32
    %c0_i32_1 = arith.constant 0 : i32
    return %c0_i32, %c0_i32_0 : i32, i32
  }
  func.func @transform_10(%arg0: i32) -> (i32, i32) {
    %c0_i32 = arith.constant 0 : i32
    %c0_i32_0 = arith.constant 0 : i32
    %c0_i32_1 = arith.constant 0 : i32
    return %c0_i32, %c0_i32_0 : i32, i32
  }
  func.func @transform_11(%arg0: i32) -> (i32, i32) {
    %c0_i32 = arith.constant 0 : i32
    %c0_i32_0 = arith.constant 0 : i32
    %c0_i32_1 = arith.constant 0 : i32
    return %c0_i32, %c0_i32_0 : i32, i32
  }
  func.func @transform_12(%arg0: i32) -> (i32, i32) {
    %c0_i32 = arith.constant 0 : i32
    %c0_i32_0 = arith.constant 0 : i32
    %c0_i32_1 = arith.constant 0 : i32
    return %c0_i32, %c0_i32_0 : i32, i32
  }
  func.func @transform_13(%arg0: i32) -> (i32, i32) {
    %c0_i32 = arith.constant 0 : i32
    %c0_i32_0 = arith.constant 0 : i32
    return %c0_i32, %arg0 : i32, i32
  }
}

</mosaic_0001>

<bundles_post_ra>
// kernel: tpu_custom_call.1
= control target key start
LH: loop header
LB: loop body
LE: loop exit
PB: predicated region body
PF: predicated region fallthrough
CT: control target
= control target key end

     0   :  { %18 = vsyncpa [#allocation3], 0  ;;  %s4047_s0 = inlined_call_operand.vmem [shape: bf16[256,800], index: 0, kind: input, shape index: {}]   ;;  %s4048_s1 = inlined_call_operand.vmem [shape: bf16[800,128], index: 1, kind: input, shape index: {}]   ;;  %s4049_s2 = inlined_call_operand.vmem [shape: f32[1,128], index: 2, kind: input, shape index: {}]   ;;  %s4050_s3 = inlined_call_operand.vmem [shape: bf16[128,128], index: 3, kind: input, shape index: {}]   ;;  %s4051_s4 = inlined_call_operand.vmem [shape: f32[1,128], index: 4, kind: input, shape index: {}]   ;;  %s4052_s5 = inlined_call_operand.vmem [shape: bf16[128,128], index: 5, kind: input, shape index: {}]   ;;  %s4053_s6 = inlined_call_operand.vmem [shape: f32[1,128], index: 6, kind: input, shape index: {}]   ;;  %s4054_s7 = inlined_call_operand.vmem [shape: bf16[128,128], index: 7, kind: input, shape index: {}]   ;;  %s4055_s8 = inlined_call_operand.vmem [shape: f32[1,128], index: 8, kind: input, shape index: {}]   ;;  %s4056_s9 = inlined_call_operand.vmem [shape: bf16[128,128], index: 9, kind: input, shape index: {}]   ;;  %s4057_s10 = inlined_call_operand.vmem [shape: f32[1,128], index: 10, kind: input, shape index: {}]   ;;  %s4058_s11 = inlined_call_operand.vmem [shape: bf16[8,128], index: 11, kind: input, shape index: {}]   ;;  %s4059_s12 = inlined_call_operand.vmem [shape: f32[8,1], index: 12, kind: input, shape index: {}]   ;;  %s4060_s13 = inlined_call_operand.hbm [shape: f32[8,256], index: 13, kind: output, shape index: {}]  }
   0x1   :  { %20 = vsyncpa [#allocation3 + $0x1], 0  ;;  %s3469_s25 = smov 0   ;;  %s3471_s26 = smov 0  }
   0x2   :  { %s3473_s27 = smov 0   ;;  %s3475_s28 = smov 0  }
   0x3 LB: > { %4064 = sst [smem:[#allocation5_spill]] %s3389_s27  ;;  %s3490_s29 = sadd.s32 4294967295, %s3393_s28   ;;  %s3393_s28 = sphi %s3475_s28, %s4069_s28   ;;  %s3389_s27 = sphi %s3473_s27, %s4071_s27   ;;  %s3385_s26 = sphi %s3471_s26, %s4073_s26   ;;  %s3381_s25 = sphi %s3469_s25, %s4072_s25  }
   0x4   : > { %s2522_s30 = sadd.s32 4294967294, %s3393_s28   ;;  %s3494_s14 = sadd.s32 1, %s3393_s28  }
   0x5   : > { %4065 = sst [smem:[#allocation6_spill]] %s3494_s14  ;;  %s311_s15 = sadd.s32 1, %s3389_s27 }
   0x6   : > { %s308_s16 = ssub.s32 %s3393_s28, %s3494_s14  ;;  %p321_p0 = scmp.ne.s32.totalorder %s3389_s27, %s3385_s26 }
   0x7   : > { %p309_p1 = scmp.eq.s32.totalorder %s308_s16, 0  ;;  %p322_p2 = scmp.eq.s32.totalorder %s3490_s29, 1 }
   0x8   : > { %p327_p3 = scmp.ne.s32.totalorder %s3385_s26, %s3381_s25  ;;  %p328_p4 = scmp.eq.s32.totalorder %s2522_s30, 1 }
   0x9   : > { %s3505_s17 = scalar_select %p309_p1, %s3389_s27, %s311_s15  }
   0xa   : > { %p3507_p5 = por %p322_p2, %p321_p0  ;;  %p3511_p6 = por %p328_p4, %p327_p3 }
   0xb   : > { %4066 = sst [smem:[#allocation7_spill]] %s3505_s17  ;;  %p2525_p7 = scmp.ge.s32.totalorder %s3393_s28, 1 }
   0xc   : > { %p392_p8 = scmp.lt.s32.totalorder %s3393_s28, 3 }
   0xe   : > { %p393_p9 = pnand %p2525_p7, %p392_p8 }
   0xf   : > { %s2527_s17 = sshll.u32 (!%p393_p9), %s3490_s29, 4  ;;  %s434_s27 = sand.u32 (!%p393_p9), 1, %s3385_s26  }
  0x10   : > { %396 = sbr.rel (%p393_p9) target bundleno = 1476 (0x5c4), region = 72  ;;  %p438_p10 = scmp.lt.s32.totalorder (!%p393_p9), %s2527_s17, 31 }
  0x11   : > { %s2681_s16 = sshll.u32 (!%p393_p9), %s3490_s29, 7  ;;  %s2450_s24 = scalar_lea.sflag (!%p393_p9), [#allocation3], %s434_s27 }
  0x12   : > { %s4006_s22 = scalar_lea.hbm (!%p393_p9), %s4060_s13, %s2681_s16  ;;  %s3398_s29 = smov (!%p393_p9), [#allocation2]  }
  0x13   : > { %s3337_s15 = sshll.u32 (!%p393_p9), %s3398_s29, 4  ;;  %s3338_s15 = int_to_ptr.vmem [resolvable:$false] %s3337_s15 }
  0x15   : > { %v3171_v0 = vld [vmem:[%s4048_s1 + $0x78] sm:$0xff]   ;;  %v3175_v4 = vld [vmem:[%s4048_s1 + $0x70] sm:$0xff]   ;;  %v3179_v8 = vld [vmem:[%s4048_s1 + $0x68] sm:$0xff]   ;;  %s4075_s17 = smov (!%p438_p10, %s2527_s17), 31  ;;  %vm1196_vm0 = vcmask 261120   ;;  %vm3396_vm1 = vmmov 0  }
  0x16   : > { %v3172_v1 = vld [vmem:[%s4048_s1 + $0x38] sm:$0xff]   ;;  %2684 = vmatprep.subr.bf16.mxu0 %v3171_v0  ;;  %v3176_v5 = vld [vmem:[%s4048_s1 + $0x30] sm:$0xff]   ;;  %v3180_v9 = vld [vmem:[%s4048_s1 + $0x28] sm:$0xff]   ;;  %s3127_s23 = smul.u32 28, %s4075_s17 }
  0x17   : > { %v3173_v2 = vld [vmem:[%s4048_s1 + $0xf8] sm:$0xff]   ;;  %2685 = vmatpush3.bf16.msra.mxu0 %v3172_v1  ;;  %v3177_v6 = vld [vmem:[%s4048_s1 + $0xf0] sm:$0xff]   ;;  %v3181_v10 = vld [vmem:[%s4048_s1 + $0xe8] sm:$0xff]  }
  0x18   : > { %v3174_v3 = vld [vmem:[%s4048_s1 + $0xb8] sm:$0xff]   ;;  %2748 = vmatprep.subr.bf16.mxu1 %v3173_v2  ;;  %2686 = vmatprep.subr.bf16.mxu0 %v3175_v4  ;;  %v3178_v7 = vld [vmem:[%s4048_s1 + $0xb0] sm:$0xff]   ;;  %v3182_v11 = vld [vmem:[%s4048_s1 + $0xa8] sm:$0xff]   ;;  %s3608_s14 = scalar_lea.vmem %s4047_s0, %s3127_s23  ;;  %s2526_s23 = sshll.u32 %s434_s27, 3 }
  0x19   : > { %2749 = vmatpush3.bf16.msra.mxu1 %v3174_v3  ;;  %v3183_v12 = vld [vmem:[%s4048_s1 + $0x60] sm:$0xff]   ;;  %v3187_v16 = vld [vmem:[%s4048_s1 + $0x58] sm:$0xff]   ;;  %v3191_v20 = vld [vmem:[%s4048_s1 + $0x50] sm:$0xff]   ;;  %s436_s20 = scalar_lea.vmem [#allocation2], %s2526_s23  ;;  %s3339_s23 = scalar_lea.vmem %s3338_s15, 256 }
  0x1a   : > { %2750 = vmatprep.subr.bf16.mxu1 %v3177_v6  ;;  %v3184_v13 = vld [vmem:[%s4048_s1 + $0x20] sm:$0xff]   ;;  %v3188_v17 = vld [vmem:[%s4048_s1 + $0x18] sm:$0xff]   ;;  %v3192_v21 = vld [vmem:[%s4048_s1 + $0x10] sm:$0xff]   ;;  %s2463_s21 = sshll.u32 %s436_s20, 4  ;;  %s4008_s21 = int_to_ptr.vmem [resolvable:$true] %s2463_s21 }
  0x1b   : > { %2687 = vmatpush3.bf16.msra.mxu0 %v3176_v5  ;;  %v3185_v14 = vld [vmem:[%s4048_s1 + $0xe0] sm:$0xff]   ;;  %v3189_v18 = vld [vmem:[%s4048_s1 + $0xd8] sm:$0xff]   ;;  %v3193_v22 = vld [vmem:[%s4048_s1 + $0xd0] sm:$0xff]   ;;  %s3333_s30 = scalar_lea.vmem %s4008_s21, 128  ;;  %p3340_p0 = scmp.lt.s32.totalorder %s4008_s21, %s3338_s15 }
  0x1c   : > { %2688 = vmatprep.subr.bf16.mxu0 %v3179_v8  ;;  %v3186_v15 = vld [vmem:[%s4048_s1 + $0xa0] sm:$0xff]   ;;  %v3190_v19 = vld [vmem:[%s4048_s1 + $0x98] sm:$0xff]   ;;  %v3194_v23 = vld [vmem:[%s4048_s1 + $0x90] sm:$0xff]   ;;  %p3334_p11 = scmp.ne.s32.totalorder %s4008_s21, %s3333_s30  ;;  %p3341_p1 = scmp.lt.s32.totalorder %s3339_s23, %s3333_s30 }
  0x1d   : > { %2751 = vmatpush3.bf16.msra.mxu1 %v3178_v7  ;;  %v3195_v24 = vld [vmem:[%s4048_s1 + $0x48] sm:$0xff]   ;;  %v3199_v28 = vld [vmem:[%s4048_s1 + $0x40] sm:$0xff]   ;;  %v3206_v34 = vld [vmem:[%s4048_s1 + $0x178] sm:$0xff]  }
  0x1e   : > { %2752 = vmatprep.subr.bf16.mxu1 %v3181_v10  ;;  %v3196_v25 = vld [vmem:[%s4048_s1 + $0x8] sm:$0xff]   ;;  %v3200_v29 = vld [vmem:[%s4048_s1] sm:$0xff]   ;;  %v3210_v37 = vld [vmem:[%s4048_s1 + $0x138] sm:$0xff]   ;;  %p3335_p12 = pnand %p3334_p11, %p3507_p5  ;;  %p3342_p2 = por %p3341_p1, %p3340_p0 }
  0x1f   : > { %2689 = vmatpush3.bf16.msra.mxu0 %v3180_v9  ;;  %v3197_v26 = vld [vmem:[%s4048_s1 + $0xc8] sm:$0xff]   ;;  %v3201_v30 = vld [vmem:[%s4048_s1 + $0xc0] sm:$0xff]   ;;  %v3211_v38 = vld [vmem:[%s3608_s14 + $0x3c] ss:$28 sps:$4 sm:$0xff]  }
  0x20   : > { %2690 = vmatprep.subr.bf16.mxu0 %v3183_v12  ;;  %v3198_v27 = vld [vmem:[%s4048_s1 + $0x88] sm:$0xff]   ;;  %v3202_v31 = vld [vmem:[%s3608_s14] ss:$28 sps:$4 sm:$0xff]   ;;  %v3213_v39 = vld [vmem:[%s3608_s14 + $0x38] ss:$28 sps:$4 sm:$0xff]   ;;  %p3336_p13 = pneg %p3335_p12 }
  0x21   : > { %2753 = vmatpush3.bf16.msra.mxu1 %v3182_v11  ;;  %v3204_v32 = vld [vmem:[%s3608_s14 + $0x4] ss:$28 sps:$4 sm:$0xff]   ;;  %v3209_v36 = vld [vmem:[%s3608_s14 + $0xc] ss:$28 sps:$4 sm:$0xff]   ;;  %v3214_v40 = vld [vmem:[%s4048_s1 + $0x170] sm:$0xff]  }
  0x22   : > { %2754 = vmatprep.subr.bf16.mxu1 %v3185_v14  ;;  %v3205_v33 = vld [vmem:[%s4048_s1 + $0x80] sm:$0xff]   ;;  %1253 = vmatprep.mubr.bf16.mxu0 %v3204_v32  ;;  %v3217_v42 = vld [vmem:[%s4048_s1 + $0x130] sm:$0xff]   ;;  %v3222_v45 = vld [vmem:[%s4048_s1 + $0x168] sm:$0xff]   ;;  %p3343_p3 = pnand %p3342_p2, %p3336_p13 }
  0x23   : > { %2691 = vmatpush3.bf16.msra.mxu0 %v3184_v13  ;;  %v3207_v35 = vld [vmem:[%s3608_s14 + $0x8] ss:$28 sps:$4 sm:$0xff]   ;;  %1350 = vmatprep.mubr.bf16.mxu1 %v3209_v36  ;;  %v3218_v43 = vld [vmem:[%s3608_s14 + $0x40] ss:$28 sps:$4 sm:$0xff]   ;;  %v3219_v44 = vld [vmem:[%s3608_s14 + $0x74] ss:$28 sps:$4 sm:$0xff]  }
  0x24   : > { %2692 = vmatprep.subr.bf16.mxu0 %v3187_v16  ;;  %v3215_v41 = vld [vmem:[%s3608_s14 + $0x44] ss:$28 sps:$4 sm:$0xff]   ;;  %v3223_v46 = vld [vmem:[%s3608_s14 + $0x7c] ss:$28 sps:$4 sm:$0xff]   ;;  %v3225_v47 = vld [vmem:[%s4048_s1 + $0x128] sm:$0xff]  }
  0x25   : > { %2755 = vmatpush3.bf16.msra.mxu1 %v3186_v15  ;;  %v3221_v48 = vld [vmem:[%s3608_s14 + $0x70] ss:$28 sps:$4 sm:$0xff]   ;;  %v3230_v50 = vld [vmem:[%s4048_s1 + $0x160] sm:$0xff]   ;;  %v3226_v51 = vld [vmem:[%s3608_s14 + $0x78] ss:$28 sps:$4 sm:$0xff]  }
  0x26   : > { %2756 = vmatprep.subr.bf16.mxu1 %v3189_v18  ;;  %v3227_v49 = vld [vmem:[%s3608_s14 + $0xac] ss:$28 sps:$4 sm:$0xff]   ;;  %v3233_v52 = vld [vmem:[%s4048_s1 + $0x120] sm:$0xff]   ;;  %v3231_v53 = vld [vmem:[%s3608_s14 + $0xb4] ss:$28 sps:$4 sm:$0xff]  }
  0x27   : > { %2693 = vmatpush3.bf16.msra.mxu0 %v3188_v17  ;;  %v3238_v54 = vld [vmem:[%s4048_s1 + $0x158] sm:$0xff]   ;;  %v3229_v55 = vld [vmem:[%s3608_s14 + $0xa8] ss:$28 sps:$4 sm:$0xff]   ;;  %v3234_v59 = vld [vmem:[%s3608_s14 + $0xb0] ss:$28 sps:$4 sm:$0xff]  }
  0x28   : > { %2694 = vmatprep.subr.bf16.mxu0 %v3191_v20  ;;  %v3241_v56 = vld [vmem:[%s4048_s1 + $0x118] sm:$0xff]   ;;  %v3235_v57 = vld [vmem:[%s3608_s14 + $0xe4] ss:$28 sps:$4 sm:$0xff]   ;;  %v3243_v58 = vld [vmem:[%s4048_s1 + $0x188] sm:$0xff]  }
  0x29   : > { %2757 = vmatpush3.bf16.msra.mxu1 %v3190_v19  ;;  %v3247_v60 = vld [vmem:[%s4048_s1 + $0x150] sm:$0xff]   ;;  %v3239_v61 = vld [vmem:[%s3608_s14 + $0xec] ss:$28 sps:$4 sm:$0xff]   ;;  %v3237_v63 = vld [vmem:[%s3608_s14 + $0xe0] ss:$28 sps:$4 sm:$0xff]  }
  0x2a   : > { %2758 = vmatprep.subr.bf16.mxu1 %v3193_v22  ;;  %v3250_v62 = vld [vmem:[%s4048_s1 + $0x110] sm:$0xff]   ;;  %v3255_v0 = vld [vmem:[%s4048_s1 + $0x148] sm:$0xff]   ;;  %v3244_v1 = vld [vmem:[%s3608_s14 + $0x11c] ss:$28 sps:$4 sm:$0xff]  }
  0x2b   : > { %2695 = vmatpush3.bf16.msra.mxu0 %v3192_v21  ;;  %v3258_v2 = vld [vmem:[%s4048_s1 + $0x108] sm:$0xff]   ;;  %v3248_v4 = vld [vmem:[%s3608_s14 + $0x124] ss:$28 sps:$4 sm:$0xff]   ;;  %v3246_v7 = vld [vmem:[%s3608_s14 + $0x118] ss:$28 sps:$4 sm:$0xff]  }
  0x2c   : > { %2696 = vmatprep.subr.bf16.mxu0 %v3195_v24  ;;  %v3242_v3 = vld [vmem:[%s3608_s14 + $0xe8] ss:$28 sps:$4 sm:$0xff]   ;;  %v3252_v8 = vld [vmem:[%s3608_s14 + $0x154] ss:$28 sps:$4 sm:$0xff]   ;;  %v3251_v10 = vld [vmem:[%s3608_s14 + $0x120] ss:$28 sps:$4 sm:$0xff]  }
  0x2d   : > { %2759 = vmatpush3.bf16.msra.mxu1 %v3194_v23  ;;  %v3263_v5 = vld [vmem:[%s4048_s1 + $0x140] sm:$0xff]   ;;  %v3256_v11 = vld [vmem:[%s3608_s14 + $0x15c] ss:$28 sps:$4 sm:$0xff]   ;;  %v3254_v12 = vld [vmem:[%s3608_s14 + $0x150] ss:$28 sps:$4 sm:$0xff]  }
  0x2e   : > { %2760 = vmatprep.subr.bf16.mxu1 %v3197_v26  ;;  %v3266_v6 = vld [vmem:[%s4048_s1 + $0x100] sm:$0xff]   ;;  %v3260_v13 = vld [vmem:[%s3608_s14 + $0x18c] ss:$28 sps:$4 sm:$0xff]   ;;  %v3259_v14 = vld [vmem:[%s3608_s14 + $0x158] ss:$28 sps:$4 sm:$0xff]  }
  0x2f   : > { %2697 = vmatpush3.bf16.msra.mxu0 %v3196_v25  ;;  %v3271_v9 = vld [vmem:[%s4048_s1 + $0x180] sm:$0xff]   ;;  %v3264_v15 = vld [vmem:[%s3608_s14 + $0x194] ss:$28 sps:$4 sm:$0xff]   ;;  %v3274_v21 = vld [vmem:[%s3608_s14 + $0x4c] ss:$28 sps:$4 sm:$0xff]  }
  0x30   : > { %2698 = vmatprep.subr.bf16.mxu0 %v3199_v28  ;;  %v3262_v16 = vld [vmem:[%s3608_s14 + $0x188] ss:$28 sps:$4 sm:$0xff]   ;;  %v3270_v17 = vld [vmem:[%s3608_s14 + $0x14] ss:$28 sps:$4 sm:$0xff]   ;;  %v3281_v26 = vld [vmem:[%s3608_s14 + $0xc0] ss:$28 sps:$4 sm:$0xff]  }
  0x31   : > { %2761 = vmatpush3.bf16.msra.mxu1 %v3198_v27  ;;  %v3267_v18 = vld [vmem:[%s3608_s14 + $0x190] ss:$28 sps:$4 sm:$0xff]   ;;  %v3272_v19 = vld [vmem:[%s3608_s14 + $0x18] ss:$28 sps:$4 sm:$0xff]   ;;  %v3280_v23 = vld [vmem:[%s3608_s14 + $0x88] ss:$28 sps:$4 sm:$0xff]  }
  0x32   : > { %2762 = vmatprep.subr.bf16.mxu1 %v3201_v30  ;;  %v3268_v20 = vld [vmem:[%s3608_s14 + $0x10] ss:$28 sps:$4 sm:$0xff]   ;;  %v3276_v24 = vld [vmem:[%s3608_s14 + $0x48] ss:$28 sps:$4 sm:$0xff]   ;;  %v3288_v27 = vld [vmem:[%s3608_s14 + $0xf8] ss:$28 sps:$4 sm:$0xff]  }
  0x33   : > { %2699 = vmatpush3.bf16.msra.mxu0 %v3200_v29  ;;  %v3273_v22 = vld [vmem:[%s3608_s14 + $0x50] ss:$28 sps:$4 sm:$0xff]   ;;  %v3277_v25 = vld [vmem:[%s3608_s14 + $0x84] ss:$28 sps:$4 sm:$0xff]   ;;  %v3282_v29 = vld [vmem:[%s3608_s14 + $0xbc] ss:$28 sps:$4 sm:$0xff]  }
  0x34   : > { %2812 = vmatprep.subr.bf16.mxu0 %v3206_v34  ;;  %v3279_v28 = vld [vmem:[%s3608_s14 + $0x80] ss:$28 sps:$4 sm:$0xff]   ;;  %v3289_v30 = vld [vmem:[%s3608_s14 + $0x130] ss:$28 sps:$4 sm:$0xff]   ;;  %v3284_v32 = vld [vmem:[%s3608_s14 + $0xb8] ss:$28 sps:$4 sm:$0xff]  }
  0x35   : > { %2763 = vmatpush3.bf16.msra.mxu1 %v3205_v33  ;;  %v3285_v33 = vld [vmem:[%s3608_s14 + $0xf4] ss:$28 sps:$4 sm:$0xff]   ;;  %v3297_v34 = vld [vmem:[%s3608_s14 + $0x1a0] ss:$28 sps:$4 sm:$0xff]   ;;  %v3290_v36 = vld [vmem:[%s3608_s14 + $0x12c] ss:$28 sps:$4 sm:$0xff]  }
  0x36   : > { %1254 = vmatmul.mubr.bf16.vlgmr.msra.gmra.mxu0 %v3202_v31  ;;  %2959 = vmatprep.subr.bf16.mxu1 %v3243_v58  ;;  %v3296_v31 = vld [vmem:[%s3608_s14 + $0x168] ss:$28 sps:$4 sm:$0xff]  }
  0x37   : > { %2813 = vmatpush3.bf16.msra.mxu0 %v3210_v37  ;;  %1261 = vmatprep.mubr.bf16.mxu0 %v3211_v38  ;;  %v3292_v37 = vld [vmem:[%s3608_s14 + $0x128] ss:$28 sps:$4 sm:$0xff]  }
  0x38   : > { %1351 = vmatmul.mubr.bf16.vlgmr.msra.gmra.mxu1 %v3207_v35  ;;  %2814 = vmatprep.subr.bf16.mxu0 %v3214_v40  ;;  %v3287_v35 = vld [vmem:[%s3608_s14 + $0xf0] ss:$28 sps:$4 sm:$0xff]   ;;  %v3293_v38 = vld [vmem:[%s3608_s14 + $0x164] ss:$28 sps:$4 sm:$0xff]   ;;  %v3298_v40 = vld [vmem:[%s3608_s14 + $0x19c] ss:$28 sps:$4 sm:$0xff]  }
  0x39   : > { %1358 = vmatprep.mubr.bf16.mxu1 %v3215_v41  ;;  %2960 = vmatpush3.bf16.msra.mxu1 %v3243_v58  ;;  %v3300_v41 = vld [vmem:[%s3608_s14 + $0x198] ss:$28 sps:$4 sm:$0xff]  }
  0x3a   : > { %2961 = vmatprep.subr.bf16.mxu1 %v3271_v9 }
  0x3b   : > { %2815 = vmatpush3.bf16.msra.mxu0 %v3217_v42  ;;  %v3301_v42 = vld [vmem:[%s4050_s3 + $0x38] sm:$0xff]  }
  0x3c   : > { %2816 = vmatprep.subr.bf16.mxu0 %v3222_v45  ;;  %v3304_v45 = vld [vmem:[%s4050_s3 + $0x20] sm:$0xff]  }
  0x3d   : > { %2962 = vmatpush3.bf16.msra.mxu1 %v3271_v9 }
  0x3e   : > { %1262 = vmatmul.mubr.bf16.gmra.mxu0 %v3213_v39  ;;  %v3295_v39 = vld [vmem:[%s3608_s14 + $0x160] ss:$28 sps:$4 sm:$0xff]   ;;  %2979 = vmatprep.subr.bf16.mxu1 %v3301_v42 }
  0x3f   : > { %1269 = vmatprep.mubr.bf16.mxu0 %v3219_v44  ;;  %2817 = vmatpush3.bf16.msra.mxu0 %v3225_v47  ;;  %v3303_v44 = vld [vmem:[%s4050_s3 + $0x28] sm:$0xff]   ;;  %v3306_v47 = vld [vmem:[%s4050_s3 + $0x10] sm:$0xff]  }
  0x40   : > { %1359 = vmatmul.mubr.bf16.gmra.mxu1 %v3218_v43  ;;  %2818 = vmatprep.subr.bf16.mxu0 %v3230_v50  ;;  %v3302_v43 = vld [vmem:[%s4050_s3 + $0x30] sm:$0xff]  }
  0x41   : > { %1366 = vmatprep.mubr.bf16.mxu1 %v3223_v46  ;;  %v3305_v46 = vld [vmem:[%s4050_s3 + $0x18] sm:$0xff]  }
  0x43   : > { %2819 = vmatpush3.bf16.msra.mxu0 %v3233_v52 }
  0x44   : > { %2820 = vmatprep.subr.bf16.mxu0 %v3238_v54 }
  0x46   : > { %1270 = vmatmul.mubr.bf16.gmra.mxu0 %v3221_v48  ;;  %v3307_v48 = vld [vmem:[%s4050_s3 + $0x8] sm:$0xff]  }
  0x47   : > { %1277 = vmatprep.mubr.bf16.mxu0 %v3227_v49  ;;  %2821 = vmatpush3.bf16.msra.mxu0 %v3241_v56  ;;  %v3308_v49 = vld [vmem:[%s4050_s3] sm:$0xff]  }
  0x48   : > { %1367 = vmatmul.mubr.bf16.gmra.mxu1 %v3226_v51  ;;  %2822 = vmatprep.subr.bf16.mxu0 %v3247_v60  ;;  %v3764_v51 = vld [vmem:[%s4049_s2] ss:$0 sm:$0xff] }
  0x49   : > { %1374 = vmatprep.mubr.bf16.mxu1 %v3231_v53 }
  0x4b   : > { %2823 = vmatpush3.bf16.msra.mxu0 %v3250_v62 }
  0x4c   : > { %2824 = vmatprep.subr.bf16.mxu0 %v3255_v0  ;;  %v3309_v0 = vld [vmem:[%s4052_s5 + $0x38] sm:$0xff]  }
  0x4e   : > { %1278 = vmatmul.mubr.bf16.gmra.mxu0 %v3229_v55 }
  0x4f   : > { %1285 = vmatprep.mubr.bf16.mxu0 %v3235_v57  ;;  %2825 = vmatpush3.bf16.msra.mxu0 %v3258_v2 }
  0x50   : > { %1375 = vmatmul.mubr.bf16.gmra.mxu1 %v3234_v59  ;;  %2826 = vmatprep.subr.bf16.mxu0 %v3263_v5 }
  0x51   : > { %1382 = vmatprep.mubr.bf16.mxu1 %v3239_v61 }
  0x53   : > { %2827 = vmatpush3.bf16.msra.mxu0 %v3266_v6 }
  0x54   : > { %3011 = vmatprep.subr.bf16.mxu0 %v3309_v0 }
  0x56   : > { %1286 = vmatmul.mubr.bf16.gmra.mxu0 %v3237_v63 }
  0x57   : > { %1293 = vmatprep.mubr.bf16.mxu0 %v3244_v1  ;;  %v3310_v1 = vld [vmem:[%s4052_s5 + $0x30] sm:$0xff]  }
  0x58   : > { %1383 = vmatmul.mubr.bf16.gmra.mxu1 %v3242_v3 }
  0x59   : > { %1390 = vmatprep.mubr.bf16.mxu1 %v3248_v4 }
  0x5e   : > { %1294 = vmatmul.mubr.bf16.gmra.mxu0 %v3246_v7 }
  0x5f   : > { %1301 = vmatprep.mubr.bf16.mxu0 %v3252_v8  ;;  %v3311_v8 = vld [vmem:[%s4052_s5 + $0x28] sm:$0xff]  }
  0x60   : > { %1391 = vmatmul.mubr.bf16.gmra.mxu1 %v3251_v10 }
  0x61   : > { %1398 = vmatprep.mubr.bf16.mxu1 %v3256_v11 }
  0x66   : > { %1302 = vmatmul.mubr.bf16.gmra.mxu0 %v3254_v12 }
  0x67   : > { %1309 = vmatprep.mubr.bf16.mxu0 %v3260_v13 }
  0x68   : > { %1399 = vmatmul.mubr.bf16.gmra.mxu1 %v3259_v14 }
  0x69   : > { %1406 = vmatprep.mubr.bf16.mxu1 %v3264_v15  ;;  %v3312_v15 = vld [vmem:[%s4052_s5 + $0x20] sm:$0xff]  }
  0x6e   : > { %1310 = vmatmul.mubr.bf16.gmra.mxu0 %v3262_v16 }
  0x6f   : > { %1447 = vmatprep.mubr.bf16.mxu0 %v3270_v17 }
  0x70   : > { %1407 = vmatmul.mubr.bf16.gmra.mxu1 %v3267_v18 }
  0x71   : > { %2963 = vmatprep.mubr.msk.bf16.mxu1 %vm1196_vm0, %v3272_v19 }
  0x76   : > { %1448 = vmatmul.mubr.bf16.vlgmr.msra.gmra.mxu0 %v3268_v20 }
  0x77   : > { %1455 = vmatprep.mubr.bf16.mxu0 %v3274_v21  ;;  %3012 = vmatpush3.bf16.msra.mxu0 %v3309_v0 }
  0x78   : > { %2964 = vmatmul.mubr.msk.bf16.vlgmr.msra.gmra.mxu1 %vm1196_vm0, %v3273_v22  ;;  %3013 = vmatprep.subr.bf16.mxu0 %v3310_v1  ;;  %v3313_v22 = vld [vmem:[%s4052_s5 + $0x18] sm:$0xff]  }
  0x79   : > { %2967 = vmatprep.mubr.msk.bf16.mxu1 %vm1196_vm0, %v3280_v23  ;;  %2980 = vmatpush3.bf16.msra.mxu1 %v3301_v42 }
  0x7a   : > { %2981 = vmatprep.subr.bf16.mxu1 %v3302_v43 }
  0x7b   : > { %3014 = vmatpush3.bf16.msra.mxu0 %v3310_v1 }
  0x7c   : > { %3015 = vmatprep.subr.bf16.mxu0 %v3311_v8 }
  0x7d   : > { %2982 = vmatpush3.bf16.msra.mxu1 %v3302_v43 }
  0x7e   : > { %1456 = vmatmul.mubr.bf16.gmra.mxu0 %v3276_v24  ;;  %2983 = vmatprep.subr.bf16.mxu1 %v3303_v44 }
  0x7f   : > { %1463 = vmatprep.mubr.bf16.mxu0 %v3277_v25  ;;  %3016 = vmatpush3.bf16.msra.mxu0 %v3311_v8 }
  0x80   : > { %2968 = vmatmul.mubr.msk.bf16.gmra.mxu1 %vm1196_vm0, %v3281_v26  ;;  %3017 = vmatprep.subr.bf16.mxu0 %v3312_v15 }
  0x81   : > { %2971 = vmatprep.mubr.msk.bf16.mxu1 %vm1196_vm0, %v3288_v27  ;;  %2984 = vmatpush3.bf16.msra.mxu1 %v3303_v44 }
  0x82   : > { %2985 = vmatprep.subr.bf16.mxu1 %v3304_v45 }
  0x83   : > { %3018 = vmatpush3.bf16.msra.mxu0 %v3312_v15 }
  0x84   : > { %3019 = vmatprep.subr.bf16.mxu0 %v3313_v22 }
  0x85   : > { %2986 = vmatpush3.bf16.msra.mxu1 %v3304_v45 }
  0x86   : > { %1464 = vmatmul.mubr.bf16.gmra.mxu0 %v3279_v28  ;;  %2987 = vmatprep.subr.bf16.mxu1 %v3305_v46 }
  0x87   : > { %1471 = vmatprep.mubr.bf16.mxu0 %v3282_v29  ;;  %3020 = vmatpush3.bf16.msra.mxu0 %v3313_v22 }
  0x88   : > { %2972 = vmatmul.mubr.msk.bf16.gmra.mxu1 %vm1196_vm0, %v3289_v30 }
  0x89   : > { %2975 = vmatprep.mubr.msk.bf16.mxu1 %vm1196_vm0, %v3296_v31  ;;  %2988 = vmatpush3.bf16.msra.mxu1 %v3305_v46 }
  0x8a   : > { %2989 = vmatprep.subr.bf16.mxu1 %v3306_v47 }
  0x8d   : > { %2990 = vmatpush3.bf16.msra.mxu1 %v3306_v47 }
  0x8e   : > { %1472 = vmatmul.mubr.bf16.gmra.mxu0 %v3284_v32  ;;  %2991 = vmatprep.subr.bf16.mxu1 %v3307_v48 }
  0x8f   : > { %1479 = vmatprep.mubr.bf16.mxu0 %v3285_v33 }
  0x90   : > { %2976 = vmatmul.mubr.msk.bf16.gmra.mxu1 %vm1196_vm0, %v3297_v34 }
  0x91   : > { %2992 = vmatpush3.bf16.msra.mxu1 %v3307_v48 }
  0x92   : > { %2993 = vmatprep.subr.bf16.mxu1 %v3308_v49 }
  0x95   : > { %2994 = vmatpush3.bf16.msra.mxu1 %v3308_v49 }
  0x96   : > { %1480 = vmatmul.mubr.bf16.gmra.mxu0 %v3287_v35 }
  0x97   : > { %1487 = vmatprep.mubr.bf16.mxu0 %v3290_v36 }
  0x9e   : > { %1488 = vmatmul.mubr.bf16.gmra.mxu0 %v3292_v37 }
  0x9f   : > { %1495 = vmatprep.mubr.bf16.mxu0 %v3293_v38 }
  0xa6   : > { %1496 = vmatmul.mubr.bf16.gmra.mxu0 %v3295_v39 }
  0xa7   : > { %1503 = vmatprep.mubr.bf16.mxu0 %v3298_v40 }
  0xae   : > { %1504 = vmatmul.mubr.bf16.gmra.mxu0 %v3300_v41 }
  0xf6   : > { %v2700_v50 = vpop.f32.mrf.mxu0 }
  0xf8   : > { %v2701_v52 = vpop.f32.mrf.mxu0  ;;  %v2764_v54 = vpop.f32.mrf.mxu1 }
  0xf9   : > { %v2702_v53 = vadd.f32 %v2701_v52, %v2700_v50 }
  0xfa   : > { %v3766_v55 = vpop.f32.mrf.mxu0  ;;  %v2765_v57 = vpop.f32.mrf.mxu1 }
  0xfb   : > { %v1256_v56 = vadd.f32 %v2702_v53, %v3764_v51  ;;  %v2766_v58 = vadd.f32 %v2765_v57, %v2764_v54 }
  0xfc   : > { %v3769_v59 = vpop.f32.mrf.mxu0  ;;  %v3771_v60 = vpop.f32.mrf.mxu1 }
  0xfd   : > { %v3773_v61 = vadd.f32 %v2766_v58, %v1256_v56 }
  0xfe   : > { %v2706_v62 = vpop.f32.mrf.mxu0  ;;  %v3775_v63 = vpop.f32.mrf.mxu1 }
 0x100   : > { %v2707_v2 = vpop.f32.mrf.mxu0  ;;  %v2770_v4 = vpop.f32.mrf.mxu1 }
 0x101   : > { %v2708_v3 = vadd.f32 %v2707_v2, %v2706_v62 }
 0x102   : > { %v3783_v5 = vpop.f32.mrf.mxu0  ;;  %v2771_v7 = vpop.f32.mrf.mxu1 }
 0x103   : > { %v1264_v6 = vadd.f32 %v2708_v3, %v3764_v51  ;;  %v2772_v9 = vadd.f32 %v2771_v7, %v2770_v4 }
 0x104   : > { %v3789_v10 = vpop.f32.mrf.mxu0  ;;  %v3791_v11 = vpop.f32.mrf.mxu1 }
 0x105   : > { %v3793_v12 = vadd.f32 %v2772_v9, %v1264_v6 }
 0x106   : > { %v2712_v13 = vpop.f32.mrf.mxu0  ;;  %v3795_v14 = vpop.f32.mrf.mxu1 }
 0x108   : > { %v2713_v16 = vpop.f32.mrf.mxu0  ;;  %v2776_v18 = vpop.f32.mrf.mxu1 }
 0x109   : > { %v2714_v17 = vadd.f32 %v2713_v16, %v2712_v13 }
 0x10a   : > { %v3800_v19 = vpop.f32.mrf.mxu0  ;;  %v2777_v21 = vpop.f32.mrf.mxu1 }
 0x10b   : > { %v1272_v20 = vadd.f32 %v2714_v17, %v3764_v51  ;;  %v2778_v23 = vadd.f32 %v2777_v21, %v2776_v18 }
 0x10c   : > { %v3806_v24 = vpop.f32.mrf.mxu0  ;;  %v3808_v25 = vpop.f32.mrf.mxu1 }
 0x10d   : > { %v3810_v26 = vadd.f32 %v2778_v23, %v1272_v20 }
 0x10e   : > { %v2718_v27 = vpop.f32.mrf.mxu0  ;;  %v3812_v28 = vpop.f32.mrf.mxu1 }
 0x110   : > { %v2719_v29 = vpop.f32.mrf.mxu0  ;;  %v2782_v31 = vpop.f32.mrf.mxu1 }
 0x111   : > { %v2720_v30 = vadd.f32 %v2719_v29, %v2718_v27 }
 0x112   : > { %v3814_v32 = vpop.f32.mrf.mxu0  ;;  %v2783_v34 = vpop.f32.mrf.mxu1 }
 0x113   : > { %v1280_v33 = vadd.f32 %v2720_v30, %v3764_v51  ;;  %v2784_v35 = vadd.f32 %v2783_v34, %v2782_v31 }
 0x114   : > { %v3817_v36 = vpop.f32.mrf.mxu0  ;;  %v3819_v37 = vpop.f32.mrf.mxu1 }
 0x115   : > { %v3821_v38 = vadd.f32 %v2784_v35, %v1280_v33 }
 0x116   : > { %v2724_v39 = vpop.f32.mrf.mxu0  ;;  %v3823_v40 = vpop.f32.mrf.mxu1 }
 0x118   : > { %v2725_v41 = vpop.f32.mrf.mxu0  ;;  %v2788_v43 = vpop.f32.mrf.mxu1 }
 0x119   : > { %v2726_v42 = vadd.f32 %v2725_v41, %v2724_v39 }
 0x11a   : > { %v3825_v44 = vpop.f32.mrf.mxu0  ;;  %v2789_v46 = vpop.f32.mrf.mxu1 }
 0x11b   : > { %v1288_v45 = vadd.f32 %v2726_v42, %v3764_v51  ;;  %v2790_v47 = vadd.f32 %v2789_v46, %v2788_v43  ;;  %v2705_v42 = vadd.f32 %v3769_v59, %v3766_v55 }
 0x11c   : > { %v3828_v48 = vpop.f32.mrf.mxu0  ;;  %v3830_v49 = vpop.f32.mrf.mxu1 }
 0x11d   : > { %v3832_v50 = vadd.f32 %v2790_v47, %v1288_v45 }
 0x11e   : > { %v2730_v52 = vpop.f32.mrf.mxu0  ;;  %v3834_v53 = vpop.f32.mrf.mxu1 }
 0x120   : > { %v2731_v54 = vpop.f32.mrf.mxu0  ;;  %v2794_v57 = vpop.f32.mrf.mxu1 }
 0x121   : > { %v2732_v56 = vadd.f32 %v2731_v54, %v2730_v52  ;;  %v1259_v54 = vadd.f32 %v2705_v42, %v3764_v51 }
 0x122   : > { %v3836_v58 = vpop.f32.mrf.mxu0  ;;  %v2795_v0 = vpop.f32.mrf.mxu1 }
 0x123   : > { %v1296_v62 = vadd.f32 %v2732_v56, %v3764_v51  ;;  %v2796_v1 = vadd.f32 %v2795_v0, %v2794_v57  ;;  %v2769_v56 = vadd.f32 %v3775_v63, %v3771_v60  ;;  %v2775_v63 = vadd.f32 %v3795_v14, %v3791_v11 }
 0x124   : > { %v3839_v2 = vpop.f32.mrf.mxu0  ;;  %v3841_v3 = vpop.f32.mrf.mxu1 }
 0x125   : > { %v3843_v4 = vadd.f32 %v2796_v1, %v1296_v62  ;;  %v1356_v59 = vadd.f32 %v2769_v56, %v1259_v54 }
 0x126   : > { %v2736_v6 = vpop.f32.mrf.mxu0  ;;  %v3845_v7 = vpop.f32.mrf.mxu1 }
 0x128   : > { %v2737_v8 = vpop.f32.mrf.mxu0  ;;  %v2800_v13 = vpop.f32.mrf.mxu1 }
 0x129   : > { %v2738_v9 = vadd.f32 %v2737_v8, %v2736_v6  ;;  %v2711_v8 = vadd.f32 %v3789_v10, %v3783_v5 }
 0x12a   : > { %v3847_v15 = vpop.f32.mrf.mxu0  ;;  %v2801_v17 = vpop.f32.mrf.mxu1 }
 0x12b   : > { %v1304_v16 = vadd.f32 %v2738_v9, %v3764_v51  ;;  %v2802_v18 = vadd.f32 %v2801_v17, %v2800_v13  ;;  %v1267_v60 = vadd.f32 %v2711_v8, %v3764_v51 }
 0x12c   : > { %v3850_v20 = vpop.f32.mrf.mxu0  ;;  %v3852_v21 = vpop.f32.mrf.mxu1 }
 0x12d   : > { %v3854_v22 = vadd.f32 %v2802_v18, %v1304_v16  ;;  %v1364_v42 = vadd.f32 %v2775_v63, %v1267_v60 }
 0x12e   : > { %v2742_v23 = vpop.f32.mrf.mxu0  ;;  %v3856_v27 = vpop.f32.mrf.mxu1 }
 0x130   : > { %v2743_v29 = vpop.f32.mrf.mxu0  ;;  %v2806_v31 = vpop.f32.mrf.mxu1 }
 0x131   : > { %v2744_v30 = vadd.f32 %v2743_v29, %v2742_v23 }
 0x132   : > { %v3858_v33 = vpop.f32.mrf.mxu0  ;;  %v2807_v35 = vpop.f32.mrf.mxu1 }
 0x133   : > { %v1312_v34 = vadd.f32 %v2744_v30, %v3764_v51  ;;  %v2808_v39 = vadd.f32 %v2807_v35, %v2806_v31 }
 0x134   : > { %v3861_v41 = vpop.f32.mrf.mxu0  ;;  %v3865_v43 = vpop.f32.mrf.mxu1 }
 0x135   : > { %v3867_v45 = vadd.f32 %v2808_v39, %v1312_v34 }
 0x136   : > { %v2828_v46 = vpop.f32.mrf.mxu0  ;;  %v3869_v47 = vpop.f32.mrf.mxu1 }
 0x138   : > { %v2829_v52 = vpop.f32.mrf.mxu0  ;;  %v2965_v62 = vpop.f32.mrf.mxu1 }
 0x139   : > { %v2830_v57 = vadd.f32 %v2829_v52, %v2828_v46  ;;  %v2717_v46 = vadd.f32 %v3806_v24, %v3800_v19 }
 0x13a   : > { %v2831_v0 = vpop.f32.mrf.mxu0  ;;  %v1546_v6 = vpop.f32.mrf.mxu1 }
 0x13b   : > { %v1450_v1 = vadd.f32 %v2830_v57, %v3773_v61  ;;  %v1275_v14 = vadd.f32 %v2717_v46, %v3764_v51 }
 0x13c   : > { %v2832_v55 = vpop.f32.mrf.mxu0  ;;  %v2966_v13 = vpop.f32.mrf.mxu1 }
 0x13d   : > { %v2833_v9 = vadd.f32 %v2832_v55, %v2831_v0  ;;  %v1547_v17 = vadd.f32 %v1546_v6, %v1450_v1  ;;  %v2781_v6 = vadd.f32 %v3812_v28, %v3808_v25 }
 0x13e   : > { %v2834_v16 = vpop.f32.mrf.mxu0  ;;  %v1549_v23 = vpop.f32.mrf.mxu1 }
 0x13f   : > { %v1453_v18 = vadd.f32 %v2833_v9, %v1356_v59  ;;  %v1609_v35 = vmax.f32 %v1547_v17, 0.0  ;;  %v1372_v17 = vadd.f32 %v2781_v6, %v1275_v14 }
 0x140   : > { %v2835_v29 = vpop.f32.mrf.mxu0  ;;  %v2969_v34 = vpop.f32.mrf.mxu1 }
 0x141   : > { %v2836_v30 = vadd.f32 %v2835_v29, %v2834_v16  ;;  %v1550_v61 = vadd.f32 %v1549_v23, %v1453_v18 }
 0x142   : > { %v2837_v31 = vpop.f32.mrf.mxu0  ;;  %v1562_v57 = vpop.f32.mrf.mxu1 }
 0x143   : > { %v1458_v39 = vadd.f32 %v2836_v30, %v3793_v12  ;;  %v1610_v5 = vmax.f32 %v1550_v61, 0.0  ;;  %v2787_v30 = vadd.f32 %v3823_v40, %v3819_v37 }
 0x144   : > { %v2838_v10 = vpop.f32.mrf.mxu0  ;;  %v2970_v8 = vpop.f32.mrf.mxu1 }
 0x145   : > { %v1625_v52 = vpack.c.bf16 %v1610_v5, %v1609_v35  ;;  %v2839_v54 = vadd.f32 %v2838_v10, %v2837_v31  ;;  %v1555_v0 = vadd.f32 %v2965_v62, %v1458_v39  ;;  %v2723_v62 = vadd.f32 %v3817_v36, %v3814_v32 }
 0x146   : > { %v2840_v56 = vpop.f32.mrf.mxu0  ;;  %v1565_v60 = vpop.f32.mrf.mxu1 }
 0x147   : > { %v1461_v1 = vadd.f32 %v2839_v54, %v1364_v42  ;;  %2995 = vmatprep.mubr.bf16.mxu1 %v1625_v52  ;;  %v1611_v9 = vmax.f32 %v1555_v0, 0.0  ;;  %v2729_v42 = vadd.f32 %v3828_v48, %v3825_v44 }
 0x148   : > { %v2841_v11 = vpop.f32.mrf.mxu0  ;;  %v2973_v35 = vpop.f32.mrf.mxu1 }
 0x149   : > { %v1558_v12 = vadd.f32 %v2966_v13, %v1461_v1  ;;  %v2842_v55 = vadd.f32 %v2841_v11, %v2840_v56  ;;  %v1283_v13 = vadd.f32 %v2723_v62, %v3764_v51  ;;  %v1291_v40 = vadd.f32 %v2729_v42, %v3764_v51 }
 0x14a   : > { %v2843_v59 = vpop.f32.mrf.mxu0  ;;  %v1578_v56 = vpop.f32.mrf.mxu1  ;;  %v2793_v1 = vadd.f32 %v3834_v53, %v3830_v49  ;;  %v2799_v62 = vadd.f32 %v3845_v7, %v3841_v3 }
 0x14b   : > { %v1612_v16 = vmax.f32 %v1558_v12, 0.0  ;;  %v1466_v19 = vadd.f32 %v2842_v55, %v3810_v26  ;;  %v1380_v10 = vadd.f32 %v2787_v30, %v1283_v13 }
 0x14c   : > { %v2844_v24 = vpop.f32.mrf.mxu0  ;;  %v2974_v6 = vpop.f32.mrf.mxu1 }
 0x14d   : > { %v1626_v18 = vpack.c.bf16 %v1612_v16, %v1611_v9  ;;  %v2845_v23 = vadd.f32 %v2844_v24, %v2843_v59  ;;  %v1563_v63 = vadd.f32 %v1562_v57, %v1466_v19  ;;  %v1388_v59 = vadd.f32 %v2793_v1, %v1291_v40 }
 0x14e   : > { %v2846_v29 = vpop.f32.mrf.mxu0  ;;  %v1581_v24 = vpop.f32.mrf.mxu1  ;;  %v2811_v1 = vadd.f32 %v3869_v47, %v3865_v43  ;;  %v3314_v43 = vld [vmem:[%s4052_s5 + $0x10] sm:$0xff]   ;;  %v3316_v47 = vld [vmem:[%s4052_s5] sm:$0xff]  }
 0x14f   : > { %2996 = vmatmul.mubr.bf16.vlgmr.msra.gmra.mxu1 %v1626_v18  ;;  %v1469_v25 = vadd.f32 %v2845_v23, %v1372_v17  ;;  %v1613_v39 = vmax.f32 %v1563_v63, 0.0  ;;  %3021 = vmatprep.subr.bf16.mxu0 %v3314_v43 }
 0x150   : > { %v2847_v28 = vpop.f32.mrf.mxu0  ;;  %3022 = vmatpush3.bf16.msra.mxu0 %v3314_v43 }
 0x151   : > { %v2848_v61 = vadd.f32 %v2847_v28, %v2846_v29  ;;  %v1566_v26 = vadd.f32 %v1565_v60, %v1469_v25  ;;  %v2977_v29 = vpop.f32.mrf.mxu1  ;;  %v2741_v28 = vadd.f32 %v3850_v20, %v3847_v15 }
 0x152   : > { %v2849_v31 = vpop.f32.mrf.mxu0 }
 0x153   : > { %v1474_v32 = vadd.f32 %v2848_v61, %v3821_v38  ;;  %v1614_v36 = vmax.f32 %v1566_v26, 0.0  ;;  %v1594_v26 = vpop.f32.mrf.mxu1  ;;  %v1307_v7 = vadd.f32 %v2741_v28, %v3764_v51 }
 0x154   : > { %v2850_v5 = vpop.f32.mrf.mxu0 }
 0x155   : > { %v1627_v46 = vpack.c.bf16 %v1614_v36, %v1613_v39  ;;  %v2851_v52 = vadd.f32 %v2850_v5, %v2849_v31  ;;  %v1571_v57 = vadd.f32 %v2969_v34, %v1474_v32  ;;  %v2735_v34 = vadd.f32 %v3839_v2, %v3836_v58 }
 0x156   : > { %v2852_v54 = vpop.f32.mrf.mxu0  ;;  %v2805_v32 = vadd.f32 %v3856_v27, %v3852_v21 }
 0x157   : > { %v1477_v0 = vadd.f32 %v2851_v52, %v1380_v10  ;;  %2999 = vmatprep.mubr.bf16.mxu1 %v1627_v46  ;;  %v1615_v12 = vmax.f32 %v1571_v57, 0.0  ;;  %v2978_v10 = vpop.f32.mrf.mxu1 }
 0x158   : > { %v2853_v37 = vpop.f32.mrf.mxu0  ;;  %v1404_v52 = vadd.f32 %v2805_v32, %v1307_v7 }
 0x159   : > { %v1574_v38 = vadd.f32 %v2970_v8, %v1477_v0  ;;  %v2854_v11 = vadd.f32 %v2853_v37, %v2852_v54  ;;  %v1299_v8 = vadd.f32 %v2735_v34, %v3764_v51  ;;  %v1597_v0 = vpop.f32.mrf.mxu1 }
 0x15a   : > { %v2855_v14 = vpop.f32.mrf.mxu0 }
 0x15b   : > { %v1616_v55 = vmax.f32 %v1574_v38, 0.0  ;;  %v1482_v44 = vadd.f32 %v2854_v11, %v3832_v50  ;;  %v1396_v25 = vadd.f32 %v2799_v62, %v1299_v8 }
 0x15c   : > { %v2856_v48 = vpop.f32.mrf.mxu0 }
 0x15d   : > { %v2857_v9 = vadd.f32 %v2856_v48, %v2855_v14  ;;  %v1628_v16 = vpack.c.bf16 %v1616_v55, %v1615_v12  ;;  %v1579_v17 = vadd.f32 %v1578_v56, %v1482_v44 }
 0x15e   : > { %v2858_v19 = vpop.f32.mrf.mxu0 }
 0x15f   : > { %3000 = vmatmul.mubr.bf16.gmra.mxu1 %v1628_v16  ;;  %v1485_v49 = vadd.f32 %v2857_v9, %v1388_v59  ;;  %v1617_v60 = vmax.f32 %v1579_v17, 0.0  ;;  %v3319_v17 = vld [vmem:[%s4054_s7 + $0x28] sm:$0xff]  }
 0x160   : > { %v2859_v53 = vpop.f32.mrf.mxu0 }
 0x161   : > { %v2860_v18 = vadd.f32 %v2859_v53, %v2858_v19  ;;  %v1582_v50 = vadd.f32 %v1581_v24, %v1485_v49  ;;  %v3317_v19 = vld [vmem:[%s4054_s7 + $0x38] sm:$0xff]   ;;  %v3318_v24 = vld [vmem:[%s4054_s7 + $0x30] sm:$0xff]   ;;  %v3320_v49 = vld [vmem:[%s4054_s7 + $0x20] sm:$0xff]  }
 0x162   : > { %v2861_v23 = vpop.f32.mrf.mxu0  ;;  %3043 = vmatprep.subr.bf16.mxu1 %v3317_v19  ;;  %v3321_v53 = vld [vmem:[%s4054_s7 + $0x18] sm:$0xff]  }
 0x163   : > { %v1490_v58 = vadd.f32 %v2860_v18, %v3843_v4  ;;  %v1618_v2 = vmax.f32 %v1582_v50, 0.0  ;;  %3044 = vmatpush3.bf16.msra.mxu1 %v3317_v19  ;;  %v2644_v18 = vld [vmem:[%s4051_s4] ss:$0 sm:$0xff] }
 0x164   : > { %v2862_v63 = vpop.f32.mrf.mxu0  ;;  %3045 = vmatprep.subr.bf16.mxu1 %v3318_v24  ;;  %v3324_v19 = vld [vmem:[%s4054_s7] sm:$0xff]  }
 0x165   : > { %v1629_v13 = vpack.c.bf16 %v1618_v2, %v1617_v60  ;;  %v2863_v30 = vadd.f32 %v2862_v63, %v2861_v23  ;;  %v1587_v31 = vadd.f32 %v2973_v35, %v1490_v58  ;;  %v2747_v35 = vadd.f32 %v3861_v41, %v3858_v33 }
 0x166   : > { %v2864_v61 = vpop.f32.mrf.mxu0 }
 0x167   : > { %v1493_v39 = vadd.f32 %v2863_v30, %v1396_v25  ;;  %3003 = vmatprep.mubr.bf16.mxu1 %v1629_v13  ;;  %v1619_v42 = vmax.f32 %v1587_v31, 0.0  ;;  %v1315_v40 = vadd.f32 %v2747_v35, %v3764_v51  ;;  %3046 = vmatpush3.bf16.msra.mxu1 %v3318_v24  ;;  %v3325_v24 = vld [vmem:[%s4056_s9 + $0x38] sm:$0xff]  }
 0x168   : > { %v2865_v3 = vpop.f32.mrf.mxu0  ;;  %3047 = vmatprep.subr.bf16.mxu1 %v3319_v17 }
 0x169   : > { %v1590_v4 = vadd.f32 %v2974_v6, %v1493_v39  ;;  %v2866_v36 = vadd.f32 %v2865_v3, %v2864_v61  ;;  %v1412_v12 = vadd.f32 %v2811_v1, %v1315_v40 }
 0x16a   : > { %v2867_v5 = vpop.f32.mrf.mxu0 }
 0x16b   : > { %v1620_v46 = vmax.f32 %v1590_v4, 0.0  ;;  %v1498_v15 = vadd.f32 %v2866_v36, %v3854_v22  ;;  %3048 = vmatpush3.bf16.msra.mxu1 %v3319_v17  ;;  %v3326_v17 = vld [vmem:[%s4056_s9 + $0x30] sm:$0xff]  }
 0x16c   : > { %v2868_v20 = vpop.f32.mrf.mxu0  ;;  %3049 = vmatprep.subr.bf16.mxu1 %v3320_v49 }
 0x16d   : > { %v2869_v54 = vadd.f32 %v2868_v20, %v2867_v5  ;;  %v1630_v56 = vpack.c.bf16 %v1620_v46, %v1619_v42  ;;  %v1595_v37 = vadd.f32 %v1594_v26, %v1498_v15 }
 0x16e   : > { %v2870_v57 = vpop.f32.mrf.mxu0 }
 0x16f   : > { %3004 = vmatmul.mubr.bf16.gmra.mxu1 %v1630_v56  ;;  %v1501_v21 = vadd.f32 %v2869_v54, %v1404_v52  ;;  %v1621_v14 = vmax.f32 %v1595_v37, 0.0 }
 0x170   : > { %v2871_v27 = vpop.f32.mrf.mxu0  ;;  %3050 = vmatpush3.bf16.msra.mxu1 %v3320_v49  ;;  %v3327_v49 = vld [vmem:[%s4056_s9 + $0x28] sm:$0xff]  }
 0x171   : > { %v2872_v38 = vadd.f32 %v2871_v27, %v2870_v57  ;;  %v1598_v22 = vadd.f32 %v1597_v0, %v1501_v21  ;;  %3051 = vmatprep.subr.bf16.mxu1 %v3321_v53 }
 0x172   : > { %v2873_v11 = vpop.f32.mrf.mxu0 }
 0x173   : > { %v1506_v6 = vadd.f32 %v2872_v38, %v3867_v45  ;;  %v1622_v33 = vmax.f32 %v1598_v22, 0.0  ;;  %v3315_v45 = vld [vmem:[%s4052_s5 + $0x8] sm:$0xff]  }
 0x174   : > { %v2874_v41 = vpop.f32.mrf.mxu0  ;;  %3023 = vmatprep.subr.bf16.mxu0 %v3315_v45  ;;  %3052 = vmatpush3.bf16.msra.mxu1 %v3321_v53  ;;  %v3328_v53 = vld [vmem:[%s4056_s9 + $0x20] sm:$0xff]  }
 0x175   : > { %v1631_v55 = vpack.c.bf16 %v1622_v33, %v1621_v14  ;;  %v2875_v44 = vadd.f32 %v2874_v41, %v2873_v11  ;;  %v1603_v48 = vadd.f32 %v2977_v29, %v1506_v6  ;;  %3024 = vmatpush3.bf16.msra.mxu0 %v3315_v45  ;;  %v3322_v45 = vld [vmem:[%s4054_s7 + $0x10] sm:$0xff]  }
 0x176   : > { %3025 = vmatprep.subr.bf16.mxu0 %v3316_v47  ;;  %3053 = vmatprep.subr.bf16.mxu1 %v3322_v45 }
 0x177   : > { %v1509_v59 = vadd.f32 %v2875_v44, %v1412_v12  ;;  %3007 = vmatprep.mubr.bf16.mxu1 %v1631_v55  ;;  %v1623_v9 = vmax.f32 %v1603_v48, 0.0 }
 0x178   : > { %3054 = vmatpush3.bf16.msra.mxu1 %v3322_v45 }
 0x179   : > { %v1606_v34 = vadd.f32 %v2978_v10, %v1509_v59  ;;  %3026 = vmatpush3.bf16.msra.mxu0 %v3316_v47  ;;  %v3323_v47 = vld [vmem:[%s4054_s7 + $0x8] sm:$0xff]  }
 0x17a   : > { %3055 = vmatprep.subr.bf16.mxu1 %v3323_v47  ;;  %3075 = vmatprep.subr.bf16.mxu0 %v3325_v24 }
 0x17b   : > { %v1624_v51 = vmax.f32 %v1606_v34, 0.0 }
 0x17c   : > { %3056 = vmatpush3.bf16.msra.mxu1 %v3323_v47  ;;  %v3330_v47 = vld [vmem:[%s4056_s9 + $0x10] sm:$0xff]  }
 0x17d   : > { %v1632_v16 = vpack.c.bf16 %v1624_v51, %v1623_v9  ;;  %3057 = vmatprep.subr.bf16.mxu1 %v3324_v19 }
 0x17f   : > { %3008 = vmatmul.mubr.bf16.gmra.mxu1 %v1632_v16 }
 0x180   : > { %3058 = vmatpush3.bf16.msra.mxu1 %v3324_v19  ;;  %v3331_v19 = vld [vmem:[%s4056_s9 + $0x8] sm:$0xff]  }
 0x20f   : > { %v2997_v8 = vpop.f32.mrf.mxu1 }
 0x210   : > { %v1747_v60 = vadd.f32 %v2997_v8, %v2644_v18  ;;  %v3329_v8 = vld [vmem:[%s4056_s9 + $0x18] sm:$0xff]  }
 0x211   : > { %v1738_v62 = vpop.f32.mrf.mxu1 }
 0x212   : > { %v1739_v23 = vadd.f32 %v2644_v18, %v1738_v62  ;;  %v1803_v13 = vmax.f32 %v1747_v60, 0.0 }
 0x213   : > { %v2998_v50 = vpop.f32.mrf.mxu1 }
 0x214   : > { %v1750_v29 = vadd.f32 %v2998_v50, %v2644_v18  ;;  %v1801_v25 = vmax.f32 %v1739_v23, 0.0  ;;  %v2653_v50 = vld [vmem:[%s4053_s6] ss:$0 sm:$0xff] }
 0x215   : > { %v1741_v58 = vpop.f32.mrf.mxu1 }
 0x216   : > { %v1742_v2 = vadd.f32 %v2644_v18, %v1741_v58  ;;  %v1804_v63 = vmax.f32 %v1750_v29, 0.0 }
 0x218   : > { %v1802_v28 = vmax.f32 %v1742_v2, 0.0  ;;  %v1818_v61 = vpack.c.bf16 %v1804_v63, %v1803_v13 }
 0x21a   : > { %v1817_v30 = vpack.c.bf16 %v1802_v28, %v1801_v25 }
 0x21c   : > { %3027 = vmatprep.mubr.bf16.mxu0 %v1817_v30 }
 0x21d   : > { %3028 = vmatmul.mubr.bf16.vlgmr.msra.gmra.mxu0 %v1818_v61 }
 0x21e   : > { %3076 = vmatpush3.bf16.msra.mxu0 %v3325_v24  ;;  %v3332_v24 = vld [vmem:[%s4056_s9] sm:$0xff]  }
 0x21f   : > { %v3001_v26 = vpop.f32.mrf.mxu1  ;;  %3077 = vmatprep.subr.bf16.mxu0 %v3326_v17 }
 0x220   : > { %v1763_v32 = vadd.f32 %v3001_v26, %v2644_v18 }
 0x221   : > { %v1754_v31 = vpop.f32.mrf.mxu1 }
 0x222   : > { %v1755_v3 = vadd.f32 %v2644_v18, %v1754_v31  ;;  %v1807_v46 = vmax.f32 %v1763_v32, 0.0  ;;  %3078 = vmatpush3.bf16.msra.mxu0 %v3326_v17 }
 0x223   : > { %v3002_v39 = vpop.f32.mrf.mxu1  ;;  %3079 = vmatprep.subr.bf16.mxu0 %v3327_v49 }
 0x224   : > { %v1766_v7 = vadd.f32 %v3002_v39, %v2644_v18  ;;  %v1805_v10 = vmax.f32 %v1755_v3, 0.0 }
 0x225   : > { %v1757_v4 = vpop.f32.mrf.mxu1 }
 0x226   : > { %v1758_v36 = vadd.f32 %v2644_v18, %v1757_v4  ;;  %v1808_v5 = vmax.f32 %v1766_v7, 0.0  ;;  %3080 = vmatpush3.bf16.msra.mxu0 %v3327_v49 }
 0x227   : > { %3081 = vmatprep.subr.bf16.mxu0 %v3328_v53 }
 0x228   : > { %v1806_v42 = vmax.f32 %v1758_v36, 0.0  ;;  %v1820_v20 = vpack.c.bf16 %v1808_v5, %v1807_v46 }
 0x22a   : > { %v1819_v15 = vpack.c.bf16 %v1806_v42, %v1805_v10  ;;  %3082 = vmatpush3.bf16.msra.mxu0 %v3328_v53  ;;  %v2662_v53 = vld [vmem:[%s4055_s8] ss:$0 sm:$0xff] }
 0x22b   : > { %3083 = vmatprep.subr.bf16.mxu0 %v3329_v8 }
 0x22c   : > { %3031 = vmatprep.mubr.bf16.mxu0 %v1819_v15 }
 0x22d   : > { %3032 = vmatmul.mubr.bf16.gmra.mxu0 %v1820_v20 }
 0x22e   : > { %3084 = vmatpush3.bf16.msra.mxu0 %v3329_v8 }
 0x22f   : > { %v3005_v52 = vpop.f32.mrf.mxu1  ;;  %3085 = vmatprep.subr.bf16.mxu0 %v3330_v47 }
 0x230   : > { %v1779_v0 = vadd.f32 %v3005_v52, %v2644_v18 }
 0x231   : > { %v1770_v35 = vpop.f32.mrf.mxu1 }
 0x232   : > { %v1771_v56 = vadd.f32 %v2644_v18, %v1770_v35  ;;  %v1811_v38 = vmax.f32 %v1779_v0, 0.0  ;;  %3086 = vmatpush3.bf16.msra.mxu0 %v3330_v47  ;;  %v2671_v47 = vld [vmem:[%s4057_s10] ss:$0 sm:$0xff] }
 0x233   : > { %v3006_v54 = vpop.f32.mrf.mxu1  ;;  %3087 = vmatprep.subr.bf16.mxu0 %v3331_v19 }
 0x234   : > { %v1782_v57 = vadd.f32 %v3006_v54, %v2644_v18  ;;  %v1809_v40 = vmax.f32 %v1771_v56, 0.0 }
 0x235   : > { %v1773_v37 = vpop.f32.mrf.mxu1 }
 0x236   : > { %v1774_v21 = vadd.f32 %v2644_v18, %v1773_v37  ;;  %v1812_v27 = vmax.f32 %v1782_v57, 0.0  ;;  %3088 = vmatpush3.bf16.msra.mxu0 %v3331_v19 }
 0x237   : > { %3089 = vmatprep.subr.bf16.mxu0 %v3332_v24 }
 0x238   : > { %v1810_v1 = vmax.f32 %v1774_v21, 0.0  ;;  %v1822_v11 = vpack.c.bf16 %v1812_v27, %v1811_v38 }
 0x23a   : > { %v1821_v22 = vpack.c.bf16 %v1810_v1, %v1809_v40  ;;  %3090 = vmatpush3.bf16.msra.mxu0 %v3332_v24 }
 0x23c   : > { %3035 = vmatprep.mubr.bf16.mxu0 %v1821_v22 }
 0x23d   : > { %3036 = vmatmul.mubr.bf16.gmra.mxu0 %v1822_v11 }
 0x23f   : > { %v3009_v14 = vpop.f32.mrf.mxu1 }
 0x240   : > { %v1795_v55 = vadd.f32 %v3009_v14, %v2644_v18 }
 0x241   : > { %v1786_v6 = vpop.f32.mrf.mxu1 }
 0x242   : > { %v1787_v41 = vadd.f32 %v2644_v18, %v1786_v6  ;;  %v1815_v51 = vmax.f32 %v1795_v55, 0.0 }
 0x243   : > { %v3010_v33 = vpop.f32.mrf.mxu1 }
 0x244   : > { %v1798_v12 = vadd.f32 %v3010_v33, %v2644_v18  ;;  %v1813_v34 = vmax.f32 %v1787_v41, 0.0 }
 0x245   : > { %v1789_v44 = vpop.f32.mrf.mxu1 }
 0x246   : > { %v1790_v48 = vadd.f32 %v2644_v18, %v1789_v44  ;;  %v1816_v59 = vmax.f32 %v1798_v12, 0.0 }
 0x248   : > { %v1814_v9 = vmax.f32 %v1790_v48, 0.0  ;;  %v1824_v43 = vpack.c.bf16 %v1816_v59, %v1815_v51 }
 0x24a   : > { %v1823_v16 = vpack.c.bf16 %v1814_v9, %v1813_v34 }
 0x24c   : > { %3039 = vmatprep.mubr.bf16.mxu0 %v1823_v16 }
 0x24d   : > { %3040 = vmatmul.mubr.bf16.gmra.mxu0 %v1824_v43 }
 0x2dd   : > { %v3029_v62 = vpop.f32.mrf.mxu0 }
 0x2de   : > { %v1939_v58 = vadd.f32 %v3029_v62, %v2653_v50 }
 0x2df   : > { %v1930_v18 = vpop.f32.mrf.mxu0 }
 0x2e0   : > { %v1931_v29 = vadd.f32 %v2653_v50, %v1930_v18  ;;  %v1995_v30 = vmax.f32 %v1939_v58, 0.0 }
 0x2e1   : > { %v3030_v23 = vpop.f32.mrf.mxu0 }
 0x2e2   : > { %v1942_v60 = vadd.f32 %v3030_v23, %v2653_v50  ;;  %v1993_v28 = vmax.f32 %v1931_v29, 0.0 }
 0x2e3   : > { %v1933_v2 = vpop.f32.mrf.mxu0 }
 0x2e4   : > { %v1934_v63 = vadd.f32 %v2653_v50, %v1933_v2  ;;  %v1996_v25 = vmax.f32 %v1942_v60, 0.0 }
 0x2e6   : > { %v1994_v13 = vmax.f32 %v1934_v63, 0.0  ;;  %v2010_v26 = vpack.c.bf16 %v1996_v25, %v1995_v30 }
 0x2e8   : > { %v2009_v61 = vpack.c.bf16 %v1994_v13, %v1993_v28 }
 0x2ea   : > { %3059 = vmatprep.mubr.bf16.mxu1 %v2009_v61 }
 0x2eb   : > { %3060 = vmatmul.mubr.bf16.vlgmr.msra.gmra.mxu1 %v2010_v26 }
 0x2ed   : > { %v3033_v31 = vpop.f32.mrf.mxu0 }
 0x2ee   : > { %v1955_v4 = vadd.f32 %v3033_v31, %v2653_v50 }
 0x2ef   : > { %v1946_v39 = vpop.f32.mrf.mxu0 }
 0x2f0   : > { %v1947_v7 = vadd.f32 %v2653_v50, %v1946_v39  ;;  %v1999_v15 = vmax.f32 %v1955_v4, 0.0 }
 0x2f1   : > { %v3034_v3 = vpop.f32.mrf.mxu0 }
 0x2f2   : > { %v1958_v32 = vadd.f32 %v3034_v3, %v2653_v50  ;;  %v1997_v42 = vmax.f32 %v1947_v7, 0.0 }
 0x2f3   : > { %v1949_v36 = vpop.f32.mrf.mxu0 }
 0x2f4   : > { %v1950_v5 = vadd.f32 %v2653_v50, %v1949_v36  ;;  %v2000_v10 = vmax.f32 %v1958_v32, 0.0 }
 0x2f6   : > { %v1998_v46 = vmax.f32 %v1950_v5, 0.0  ;;  %v2012_v52 = vpack.c.bf16 %v2000_v10, %v1999_v15 }
 0x2f8   : > { %v2011_v20 = vpack.c.bf16 %v1998_v46, %v1997_v42 }
 0x2fa   : > { %3063 = vmatprep.mubr.bf16.mxu1 %v2011_v20 }
 0x2fb   : > { %3064 = vmatmul.mubr.bf16.gmra.mxu1 %v2012_v52 }
 0x2fd   : > { %v3037_v35 = vpop.f32.mrf.mxu0 }
 0x2fe   : > { %v1971_v37 = vadd.f32 %v3037_v35, %v2653_v50 }
 0x2ff   : > { %v1962_v54 = vpop.f32.mrf.mxu0 }
 0x300   : > { %v1963_v57 = vadd.f32 %v2653_v50, %v1962_v54  ;;  %v2003_v22 = vmax.f32 %v1971_v37, 0.0 }
 0x301   : > { %v3038_v56 = vpop.f32.mrf.mxu0 }
 0x302   : > { %v1974_v0 = vadd.f32 %v3038_v56, %v2653_v50  ;;  %v2001_v1 = vmax.f32 %v1963_v57, 0.0 }
 0x303   : > { %v1965_v21 = vpop.f32.mrf.mxu0 }
 0x304   : > { %v1966_v27 = vadd.f32 %v2653_v50, %v1965_v21  ;;  %v2004_v40 = vmax.f32 %v1974_v0, 0.0 }
 0x306   : > { %v2002_v38 = vmax.f32 %v1966_v27, 0.0  ;;  %v2014_v14 = vpack.c.bf16 %v2004_v40, %v2003_v22 }
 0x308   : > { %v2013_v11 = vpack.c.bf16 %v2002_v38, %v2001_v1 }
 0x30a   : > { %3067 = vmatprep.mubr.bf16.mxu1 %v2013_v11 }
 0x30b   : > { %3068 = vmatmul.mubr.bf16.gmra.mxu1 %v2014_v14 }
 0x30d   : > { %v3041_v6 = vpop.f32.mrf.mxu0 }
 0x30e   : > { %v1987_v44 = vadd.f32 %v3041_v6, %v2653_v50 }
 0x30f   : > { %v1978_v33 = vpop.f32.mrf.mxu0 }
 0x310   : > { %v1979_v12 = vadd.f32 %v2653_v50, %v1978_v33  ;;  %v2007_v16 = vmax.f32 %v1987_v44, 0.0 }
 0x311   : > { %v3042_v41 = vpop.f32.mrf.mxu0 }
 0x312   : > { %v1990_v55 = vadd.f32 %v3042_v41, %v2653_v50  ;;  %v2005_v9 = vmax.f32 %v1979_v12, 0.0 }
 0x313   : > { %v1981_v48 = vpop.f32.mrf.mxu0 }
 0x314   : > { %v1982_v59 = vadd.f32 %v2653_v50, %v1981_v48  ;;  %v2008_v34 = vmax.f32 %v1990_v55, 0.0 }
 0x316   : > { %v2006_v51 = vmax.f32 %v1982_v59, 0.0  ;;  %v2016_v45 = vpack.c.bf16 %v2008_v34, %v2007_v16  ;;  %v2402_v16 = vld [vmem:[%s4059_s12] sm:$0xff] }
 0x318   : > { %v2015_v43 = vpack.c.bf16 %v2006_v51, %v2005_v9  ;;  %v3395_v51 = vmov 0.0  }
 0x319   : > { %3107 = vmatprep.subr.bf16.mxu1 %v3395_v51 }
 0x31a   : > { %3071 = vmatprep.mubr.bf16.mxu1 %v2015_v43  ;;  %v3397_v43 = vmov 0  }
 0x31b   : > { %3072 = vmatmul.mubr.bf16.gmra.mxu1 %v2016_v45  ;;  %3170 = vset.pattern.permute.xlu0 %v3397_v43 }
 0x31c   : > { %3123 = vmatprep.mubr.msk.bf16.mxu1 %vm3396_vm1, %v3395_v51  ;;  %2405 = vperm.xlu0 %3170, %v2402_v16  }
 0x3ab   : > { %v3061_v17 = vpop.f32.mrf.mxu1 }
 0x3ac   : > { %v2131_v50 = vadd.f32 %v3061_v17, %v2662_v53 }
 0x3ad   : > { %v2122_v49 = vpop.f32.mrf.mxu1 }
 0x3ae   : > { %v2123_v62 = vadd.f32 %v2662_v53, %v2122_v49  ;;  %v2187_v63 = vmax.f32 %v2131_v50, 0.0 }
 0x3af   : > { %v3062_v8 = vpop.f32.mrf.mxu1 }
 0x3b0   : > { %v2134_v18 = vadd.f32 %v3062_v8, %v2662_v53  ;;  %v2185_v58 = vmax.f32 %v2123_v62, 0.0 }
 0x3b1   : > { %v2125_v23 = vpop.f32.mrf.mxu1 }
 0x3b2   : > { %v2126_v29 = vadd.f32 %v2662_v53, %v2125_v23  ;;  %v2188_v60 = vmax.f32 %v2134_v18, 0.0 }
 0x3b4   : > { %v2186_v2 = vmax.f32 %v2126_v29, 0.0  ;;  %v2202_v28 = vpack.c.bf16 %v2188_v60, %v2187_v63 }
 0x3b6   : > { %v2201_v25 = vpack.c.bf16 %v2186_v2, %v2185_v58 }
 0x3b8   : > { %3091 = vmatprep.mubr.bf16.mxu0 %v2201_v25 }
 0x3b9   : > { %3092 = vmatmul.mubr.bf16.vlgmr.msra.gmra.mxu0 %v2202_v28 }
 0x3bb   : > { %v3065_v13 = vpop.f32.mrf.mxu1 }
 0x3bc   : > { %v2147_v39 = vadd.f32 %v3065_v13, %v2662_v53 }
 0x3bd   : > { %v2138_v30 = vpop.f32.mrf.mxu1 }
 0x3be   : > { %v2139_v26 = vadd.f32 %v2662_v53, %v2138_v30  ;;  %v2191_v5 = vmax.f32 %v2147_v39, 0.0 }
 0x3bf   : > { %v3066_v61 = vpop.f32.mrf.mxu1 }
 0x3c0   : > { %v2150_v31 = vadd.f32 %v3066_v61, %v2662_v53  ;;  %v2189_v4 = vmax.f32 %v2139_v26, 0.0 }
 0x3c1   : > { %v2141_v3 = vpop.f32.mrf.mxu1 }
 0x3c2   : > { %v2142_v7 = vadd.f32 %v2662_v53, %v2141_v3  ;;  %v2192_v32 = vmax.f32 %v2150_v31, 0.0 }
 0x3c4   : > { %v2190_v36 = vmax.f32 %v2142_v7, 0.0  ;;  %v2204_v42 = vpack.c.bf16 %v2192_v32, %v2191_v5 }
 0x3c6   : > { %v2203_v10 = vpack.c.bf16 %v2190_v36, %v2189_v4 }
 0x3c8   : > { %3095 = vmatprep.mubr.bf16.mxu0 %v2203_v10 }
 0x3c9   : > { %3096 = vmatmul.mubr.bf16.gmra.mxu0 %v2204_v42 }
 0x3cb   : > { %v3069_v46 = vpop.f32.mrf.mxu1 }
 0x3cc   : > { %v2163_v54 = vadd.f32 %v3069_v46, %v2662_v53 }
 0x3cd   : > { %v2154_v15 = vpop.f32.mrf.mxu1 }
 0x3ce   : > { %v2155_v52 = vadd.f32 %v2662_v53, %v2154_v15  ;;  %v2195_v27 = vmax.f32 %v2163_v54, 0.0 }
 0x3cf   : > { %v3070_v20 = vpop.f32.mrf.mxu1 }
 0x3d0   : > { %v2166_v35 = vadd.f32 %v3070_v20, %v2662_v53  ;;  %v2193_v37 = vmax.f32 %v2155_v52, 0.0 }
 0x3d1   : > { %v2157_v56 = vpop.f32.mrf.mxu1 }
 0x3d2   : > { %v2158_v57 = vadd.f32 %v2662_v53, %v2157_v56  ;;  %v2196_v0 = vmax.f32 %v2166_v35, 0.0 }
 0x3d4   : > { %v2194_v21 = vmax.f32 %v2158_v57, 0.0  ;;  %v2206_v1 = vpack.c.bf16 %v2196_v0, %v2195_v27 }
 0x3d6   : > { %v2205_v40 = vpack.c.bf16 %v2194_v21, %v2193_v37 }
 0x3d8   : > { %3099 = vmatprep.mubr.bf16.mxu0 %v2205_v40 }
 0x3d9   : > { %3100 = vmatmul.mubr.bf16.gmra.mxu0 %v2206_v1 }
 0x3db   : > { %v3073_v38 = vpop.f32.mrf.mxu1 }
 0x3dc   : > { %v2179_v33 = vadd.f32 %v3073_v38, %v2662_v53 }
 0x3dd   : > { %v2170_v22 = vpop.f32.mrf.mxu1 }
 0x3de   : > { %v2171_v14 = vadd.f32 %v2662_v53, %v2170_v22  ;;  %v2199_v59 = vmax.f32 %v2179_v33, 0.0 }
 0x3df   : > { %v3074_v11 = vpop.f32.mrf.mxu1 }
 0x3e0   : > { %v2182_v6 = vadd.f32 %v3074_v11, %v2662_v53  ;;  %v2197_v44 = vmax.f32 %v2171_v14, 0.0 }
 0x3e1   : > { %v2173_v41 = vpop.f32.mrf.mxu1 }
 0x3e2   : > { %v2174_v12 = vadd.f32 %v2662_v53, %v2173_v41  ;;  %v2200_v55 = vmax.f32 %v2182_v6, 0.0 }
 0x3e4   : > { %v2198_v48 = vmax.f32 %v2174_v12, 0.0  ;;  %v2208_v9 = vpack.c.bf16 %v2200_v55, %v2199_v59  ;;  %v2406_v59 = vpop.permute.xlu0 %2405 }
 0x3e6   : > { %v2207_v34 = vpack.c.bf16 %v2198_v48, %v2197_v44  ;;  %v2401_v48 = vld [vmem:[%s4058_s11] sm:$0xf] }
 0x3e8   : > { %3103 = vmatprep.mubr.bf16.mxu0 %v2207_v34 }
 0x3e9   : > { %3104 = vmatmul.mubr.bf16.gmra.mxu0 %v2208_v9 }
 0x479   : > { %v3093_v45 = vpop.f32.mrf.mxu0 }
 0x47a   : > { %v2323_v24 = vadd.f32 %v3093_v45, %v2671_v47 }
 0x47b   : > { %v2314_v19 = vpop.f32.mrf.mxu0 }
 0x47c   : > { %v2315_v49 = vadd.f32 %v2671_v47, %v2314_v19  ;;  %v2379_v62 = vmax.f32 %v2323_v24, 0.0 }
 0x47d   : > { %v3094_v17 = vpop.f32.mrf.mxu0 }
 0x47e   : > { %v2326_v53 = vadd.f32 %v3094_v17, %v2671_v47  ;;  %v2377_v23 = vmax.f32 %v2315_v49, 0.0 }
 0x47f   : > { %v2317_v8 = vpop.f32.mrf.mxu0 }
 0x480   : > { %v2380_v18 = vmax.f32 %v2326_v53, 0.0  ;;  %v2318_v50 = vadd.f32 %v2671_v47, %v2317_v8 }
 0x482   : > { %v2394_v29 = vpack.c.bf16 %v2380_v18, %v2379_v62  ;;  %v2378_v60 = vmax.f32 %v2318_v50, 0.0 }
 0x484   : > { %v2393_v58 = vpack.c.bf16 %v2378_v60, %v2377_v23 }
 0x489   : > { %v3097_v2 = vpop.f32.mrf.mxu0 }
 0x48a   : > { %v2339_v22 = vadd.f32 %v3097_v2, %v2671_v47 }
 0x48b   : > { %v2330_v63 = vpop.f32.mrf.mxu0 }
 0x48c   : > { %v2383_v14 = vmax.f32 %v2339_v22, 0.0  ;;  %v2331_v41 = vadd.f32 %v2671_v47, %v2330_v63 }
 0x48d   : > { %v3098_v25 = vpop.f32.mrf.mxu0 }
 0x48e   : > { %v2342_v1 = vadd.f32 %v3098_v25, %v2671_v47  ;;  %v2381_v55 = vmax.f32 %v2331_v41, 0.0 }
 0x48f   : > { %v2333_v28 = vpop.f32.mrf.mxu0 }
 0x490   : > { %v2384_v11 = vmax.f32 %v2342_v1, 0.0  ;;  %v2334_v33 = vadd.f32 %v2671_v47, %v2333_v28 }
 0x492   : > { %v2396_v6 = vpack.c.bf16 %v2384_v11, %v2383_v14  ;;  %v2382_v12 = vmax.f32 %v2334_v33, 0.0 }
 0x494   : > { %v2395_v44 = vpack.c.bf16 %v2382_v12, %v2381_v55 }
 0x499   : > { %v3101_v13 = vpop.f32.mrf.mxu0 }
 0x49a   : > { %v2355_v54 = vadd.f32 %v3101_v13, %v2671_v47 }
 0x49b   : > { %v2346_v30 = vpop.f32.mrf.mxu0 }
 0x49c   : > { %v2387_v57 = vmax.f32 %v2355_v54, 0.0  ;;  %v2347_v21 = vadd.f32 %v2671_v47, %v2346_v30 }
 0x49d   : > { %v3102_v61 = vpop.f32.mrf.mxu0 }
 0x49e   : > { %v2358_v52 = vadd.f32 %v3102_v61, %v2671_v47  ;;  %v2385_v40 = vmax.f32 %v2347_v21, 0.0 }
 0x49f   : > { %v2349_v26 = vpop.f32.mrf.mxu0 }
 0x4a0   : > { %v2388_v56 = vmax.f32 %v2358_v52, 0.0  ;;  %v2350_v37 = vadd.f32 %v2671_v47, %v2349_v26 }
 0x4a2   : > { %v2398_v0 = vpack.c.bf16 %v2388_v56, %v2387_v57  ;;  %v2386_v27 = vmax.f32 %v2350_v37, 0.0 }
 0x4a4   : > { %v2397_v38 = vpack.c.bf16 %v2386_v27, %v2385_v40 }
 0x4a9   : > { %v3105_v31 = vpop.f32.mrf.mxu0 }
 0x4aa   : > { %v2371_v3 = vadd.f32 %v3105_v31, %v2671_v47 }
 0x4ab   : > { %v2362_v39 = vpop.f32.mrf.mxu0 }
 0x4ac   : > { %v2391_v36 = vmax.f32 %v2371_v3, 0.0  ;;  %v2363_v46 = vadd.f32 %v2671_v47, %v2362_v39 }
 0x4ad   : > { %v3106_v7 = vpop.f32.mrf.mxu0 }
 0x4ae   : > { %v2374_v32 = vadd.f32 %v3106_v7, %v2671_v47  ;;  %v2389_v20 = vmax.f32 %v2363_v46, 0.0 }
 0x4af   : > { %v2365_v4 = vpop.f32.mrf.mxu0 }
 0x4b0   : > { %v2392_v5 = vmax.f32 %v2374_v32, 0.0  ;;  %v2366_v42 = vadd.f32 %v2671_v47, %v2365_v4 }
 0x4b2   : > { %v2400_v10 = vpack.c.bf16 %v2392_v5, %v2391_v36  ;;  %v2390_v15 = vmax.f32 %v2366_v42, 0.0 }
 0x4b4   : > { %3108 = vmatpush3.bf16.xpose.msra.mxu1 %v2400_v10  ;;  %v2399_v35 = vpack.c.bf16 %v2390_v15, %v2389_v20 }
 0x4b5   : > { %3109 = vmatprep.subr.bf16.mxu1 %v3395_v51 }
 0x4bc   : > { %3110 = vmatpush3.bf16.xpose.msra.mxu1 %v2399_v35 }
 0x4bd   : > { %3111 = vmatprep.subr.bf16.mxu1 %v3395_v51 }
 0x4c4   : > { %3112 = vmatpush3.bf16.xpose.msra.mxu1 %v2398_v0 }
 0x4c5   : > { %3113 = vmatprep.subr.bf16.mxu1 %v3395_v51 }
 0x4cc   : > { %3114 = vmatpush3.bf16.xpose.msra.mxu1 %v2397_v38 }
 0x4cd   : > { %3115 = vmatprep.subr.bf16.mxu1 %v3395_v51 }
 0x4d4   : > { %3116 = vmatpush3.bf16.xpose.msra.mxu1 %v2396_v6 }
 0x4d5   : > { %3117 = vmatprep.subr.bf16.mxu1 %v3395_v51 }
 0x4dc   : > { %3118 = vmatpush3.bf16.xpose.msra.mxu1 %v2395_v44 }
 0x4dd   : > { %3119 = vmatprep.subr.bf16.mxu1 %v3395_v51 }
 0x4e4   : > { %3120 = vmatpush3.bf16.xpose.msra.mxu1 %v2394_v29 }
 0x4e5   : > { %3121 = vmatprep.subr.bf16.mxu1 %v3395_v51 }
 0x4ec   : > { %3122 = vmatpush3.bf16.xpose.msra.mxu1 %v2393_v58 }
 0x4f3   : > { %3124 = vmatmul.mubr.bf16.vlgmr.msra.gmra.mxu1 %v2401_v48 }
 0x5b3   : > { %v2442_v34 = vpop.f32.mrf.mxu1 }
 0x5b4   : > { %v2443_v9 = vadd.f32 %v2442_v34, %v2406_v59 }
 0x5b5   : > { %v3125_v51 = vpop.f32.mrf.mxu1 }
 0x5b6   : > { %2448 = vst [vmem:[%s436_s20] sm:$0xff] %v2443_v9 }
 0x5b7   : > { %v2445_v16 = vpop.f32.mrf.mxu1 }
 0x5b8   : > { %3346 = shalt.err (!%p3343_p3)
}
 0x5b9   : > { %s3347_s16 = scalar_lea.hbm %s4006_s22, 128  ;;  %s3351_s14 = scalar_lea.hbm %s4060_s13, 256 }
 0x5ba   : > { %p3348_p4 = scmp.ne.s32.totalorder %s4006_s22, %s3347_s16  ;;  %p3352_p9 = scmp.lt.s32.totalorder %s4006_s22, %s4060_s13 }
 0x5bb   : > { %p3353_p10 = scmp.lt.s32.totalorder %s3351_s14, %s3347_s16 }
 0x5bc   : > { %p3349_p7 = pnand %p3348_p4, %p3507_p5 }
 0x5bd   : > { %p3354_p11 = por %p3353_p10, %p3352_p9 }
 0x5be   : > { %p3350_p8 = pneg %p3349_p7 }
 0x5c0   : > { %p3355_p12 = pnand %p3354_p11, %p3350_p8 }
 0x5c2   : > { %3358 = shalt.err (!%p3355_p12)
}
 0x5c3   : > { %3128 = dma.vmem_to_hbm [thread:$0]  (%p3507_p5), %s4008_s21, 128, %s4006_s22, %s2450_s24   ;;  %v3126_v43 = vpop.f32.mrf.mxu1 }
 0x5c4 PF: > { %p3134_p13 = scmp.ge.s32.totalorder %s3393_s28, 2  ;;  %s2475_s30 = sand.u32 1, %s3381_s25  }
 0x5c5   : > { %s2476_s15 = scalar_lea.sflag [#allocation3], %s2475_s30 }
 0x5c6   : > { %p3131_p0 = pnand %p3134_p13, %p3511_p6 }
 0x5c8   : > { %p3132_p1 = pneg %p3131_p0 }
 0x5ca   : > { %3376 = dma.done.wait (%p3132_p1), %s2476_s15, 128  }
 0x5cb   : > { %3378 = vsyncadd (%p3132_p1), %s2476_s15, 4294967168  ;;  %s4069_s28 = sld [smem:[#allocation6_spill]]  ;;  %s4072_s25 = smov %s3385_s26 }
 0x5cc   : > { %s4070_s23 = sld [smem:[#allocation5_spill]] }
 0x5cd   : > { %s4071_s27 = sld [smem:[#allocation7_spill]] }
 0x5d1   : > { %p23_p2 = scmp.ge.s32.totalorder %s4069_s28, 4  }
 0x5d2   : > { %s4073_s26 = smov %s4070_s23 }
 0x5d3   :  { %25 = sbr.rel (!%p23_p2) target bundleno = 3 (0x3), region = 107 }
 0x5d8   :  { %2481 = vsyncpa [#allocation3], 1 }
 0x5d9   :  { %2483 = vsyncpa [#allocation3 + $0x1], 1 }

</bundles_post_ra>
